<compile_context>
chip_gen: v7x
topology: tpu7x:2x2x1
jax: 0.10.0
libtpu: 0.0.40
codegen_flags: <defaults>
</compile_context>

<pallas_src>
import functools
import jax
import jax.numpy as jnp
from jax.experimental import pallas as pl
from jax.experimental.pallas import tpu as pltpu

# ---- small synthetic BertConfig ----
VOCAB = 128
HIDDEN = 32
N_LAYERS = 2
N_HEADS = 4
HEAD_DIM = HIDDEN // N_HEADS
INTERMEDIATE = 64
MAX_POS = 16
LN_EPS = 1e-12

_SQRT1_2 = 0.7071067811865476
_VMEM_LIMIT = 32 * 1024 * 1024


# -------------------- in-kernel helpers (pure jnp, traced inside kernels) --------------------

def _erf_approx(x):
    # Abramowitz & Stegun 7.1.26 rational approximation, |err| < 1.5e-7.
    # The divide uses the EUP approximate reciprocal (otherwise-idle slot).
    a1, a2, a3, a4, a5 = 0.254829592, -0.284496736, 1.421413741, -1.453152027, 1.061405429
    pp = 0.3275911
    ax = jnp.abs(x)
    t = pl.reciprocal(1.0 + pp * ax, approx=True)
    poly = ((((a5 * t + a4) * t + a3) * t + a2) * t + a1) * t
    y = 1.0 - poly * jnp.exp(-ax * ax)
    return jnp.where(x >= 0.0, y, -y)


def _gelu(x):
    return 0.5 * x * (1.0 + _erf_approx(x * _SQRT1_2))


def _layernorm(h, g, b):
    # f32 statistics (safe on v5e which has no bf16 VPU/EUP path).
    mu = jnp.mean(h, axis=-1, keepdims=True)
    var = jnp.mean(jnp.square(h - mu), axis=-1, keepdims=True)
    return (h - mu) * jax.lax.rsqrt(var + LN_EPS) * g + b


# -------------------- Pallas kernels --------------------

def _bert_layer_kernel(x_ref, mask_ref, in_ln_g_ref, in_ln_b_ref,
                       qkv_w_ref, qkv_b_ref, ao_w_ref, ao_b_ref,
                       ln1_g_ref, ln1_b_ref, i_w_ref, i_b_ref, o_w_ref, o_b_ref,
                       ln2_g_ref, ln2_b_ref, o_ref,
                       *, n_heads, head_dim, apply_input_ln):
    """One fused BertLayer for a single batch element (grid step).

    x_ref:    (S, H)   residual stream (f32 embeddings for layer 0, bf16 after)
    mask_ref: (1, S)   additive attention mask
    Weight matrices are bf16; biases / LN params are f32.
    """
    H = n_heads * head_dim
    x = x_ref[...].astype(jnp.float32)                     # (S, H) f32
    if apply_input_ln:                                     # embedding LayerNorm fused in
        x = _layernorm(x, in_ln_g_ref[...], in_ln_b_ref[...])
    x16 = x.astype(jnp.bfloat16)

    # ---- fused Q/K/V projection: one MXU call, lane width 3H ----
    qkv = jnp.dot(x16, qkv_w_ref[...],
                  preferred_element_type=jnp.float32) + qkv_b_ref[...]   # (S, 3H) f32

    mask = mask_ref[...]                                   # (1, S) additive, f32
    scale = 1.0 / float(head_dim) ** 0.5

    # scale folded into Q once (f32), whole Q/K/V blocks cast to bf16 once.
    q_all = (qkv[:, :H] * scale).astype(jnp.bfloat16)
    k_all = qkv[:, H:2 * H].astype(jnp.bfloat16)
    v_all = qkv[:, 2 * H:3 * H].astype(jnp.bfloat16)

    # ---- self-attention, heads as value slices (no scratch refs / masked stores) ----
    # TODO(synk): at real S/head counts, switch to a (heads, S, D) layout + fori_loop
    # with a tiled query axis so only one (Tq, S) f32 score tile is live.
    ctx_heads = []
    for h in range(n_heads):
        c0 = h * head_dim
        q = q_all[:, c0:c0 + head_dim]                     # (S, D) bf16 (pre-scaled)
        k = k_all[:, c0:c0 + head_dim]
        v = v_all[:, c0:c0 + head_dim]
        # contract last axes of q and k -> no materialized K transpose
        s = jax.lax.dot_general(q, k, (((1,), (1,)), ((), ())),
                                preferred_element_type=jnp.float32)      # (S, S) f32
        s = s + mask
        s = s - jnp.max(s, axis=-1, keepdims=True)
        p = jnp.exp(s)
        p = p * pl.reciprocal(jnp.sum(p, axis=-1, keepdims=True), approx=True)
        ctx_heads.append(jnp.dot(p.astype(jnp.bfloat16), v,
                                 preferred_element_type=jnp.float32))    # (S, D) f32
    # lane-dense (S, H) context for the attention-output matmul
    ctx = jnp.concatenate(ctx_heads, axis=-1).astype(jnp.bfloat16)

    # ---- attention output projection + add & LayerNorm ----
    attn = jnp.dot(ctx, ao_w_ref[...],
                   preferred_element_type=jnp.float32) + ao_b_ref[...]
    h1 = _layernorm(attn + x, ln1_g_ref[...], ln1_b_ref[...])

    # ---- feed-forward (GELU) + add & LayerNorm ----
    inter = jnp.dot(h1.astype(jnp.bfloat16), i_w_ref[...],
                    preferred_element_type=jnp.float32) + i_b_ref[...]
    inter = _gelu(inter)
    ffn = jnp.dot(inter.astype(jnp.bfloat16), o_w_ref[...],
                  preferred_element_type=jnp.float32) + o_b_ref[...]
    o_ref[...] = _layernorm(ffn + h1, ln2_g_ref[...], ln2_b_ref[...]).astype(o_ref.dtype)


def bert_layer(x, mask_add, L, B, S, *, apply_input_ln, in_ln_g, in_ln_b):
    """One BertLayer as a single pallas_call.

    x: (B*S, H) f32 (layer 0) or bf16; mask_add: (B, 1, S) f32.  Output is bf16.
    """
    H = HIDDEN
    I = INTERMEDIATE
    kernel = functools.partial(_bert_layer_kernel, n_heads=N_HEADS, head_dim=HEAD_DIM,
                               apply_input_ln=apply_input_ln)

    flops = B * (2 * S * H * 3 * H           # QKV projection
                 + N_HEADS * 4 * S * S * HEAD_DIM   # scores + context
                 + 2 * S * H * H             # attention output
                 + 4 * S * H * I)            # FFN (two matmuls)
    transcendentals = B * (N_HEADS * S * S + S * I)
    weight_bytes = (H * 3 * H + H * H + 2 * H * I) * 2 + (3 * H + 6 * H + I) * 4
    bytes_accessed = int(B * S * H * (x.dtype.itemsize + 2) + B * S * 4 + weight_bytes)

    return pl.pallas_call(
        kernel,
        out_shape=jax.ShapeDtypeStruct((B * S, H), jnp.bfloat16),
        grid=(B,),
        in_specs=[
            pl.BlockSpec((S, H), lambda b: (b, 0)),             # x (per-batch rows)
            pl.BlockSpec((None, 1, S), lambda b: (b, 0, 0)),    # additive mask
            pl.BlockSpec((1, H), lambda b: (0, 0)),             # (fused) input LN gamma
            pl.BlockSpec((1, H), lambda b: (0, 0)),             # (fused) input LN beta
            pl.BlockSpec((H, 3 * H), lambda b: (0, 0)),         # fused qkv weight (bf16)
            pl.BlockSpec((1, 3 * H), lambda b: (0, 0)),         # fused qkv bias
            pl.BlockSpec((H, H), lambda b: (0, 0)),             # attn output w (bf16)
            pl.BlockSpec((1, H), lambda b: (0, 0)),             # attn output b
            pl.BlockSpec((1, H), lambda b: (0, 0)),             # ln1 gamma
            pl.BlockSpec((1, H), lambda b: (0, 0)),             # ln1 beta
            pl.BlockSpec((H, I), lambda b: (0, 0)),             # intermediate w (bf16)
            pl.BlockSpec((1, I), lambda b: (0, 0)),             # intermediate b
            pl.BlockSpec((I, H), lambda b: (0, 0)),             # ffn output w (bf16)
            pl.BlockSpec((1, H), lambda b: (0, 0)),             # ffn output b
            pl.BlockSpec((1, H), lambda b: (0, 0)),             # ln2 gamma
            pl.BlockSpec((1, H), lambda b: (0, 0)),             # ln2 beta
        ],
        out_specs=pl.BlockSpec((S, H), lambda b: (b, 0)),
        compiler_params=pltpu.CompilerParams(
            dimension_semantics=("parallel",),
            vmem_limit_bytes=_VMEM_LIMIT),
        cost_estimate=pl.CostEstimate(flops=flops, transcendentals=transcendentals,
                                      bytes_accessed=bytes_accessed),
    )(x, mask_add,
      in_ln_g.reshape(1, H), in_ln_b.reshape(1, H),
      L["qkv_w"], L["qkv_b"].reshape(1, 3 * H),
      L["ao_w"], L["ao_b"].reshape(1, H),
      L["ln1_g"].reshape(1, H), L["ln1_b"].reshape(1, H),
      L["i_w"], L["i_b"].reshape(1, I),
      L["o_w"], L["o_b"].reshape(1, H),
      L["ln2_g"].reshape(1, H), L["ln2_b"].reshape(1, H))


def _mlm_head_kernel(x_ref, tr_w_ref, tr_b_ref, ln_g_ref, ln_b_ref,
                     dec_w_ref, dec_b_ref, o_ref):
    """BertOnlyMLMHead: transform dense + GELU + LN, then tied decoder + bias."""
    h = jnp.dot(x_ref[...], tr_w_ref[...],
                preferred_element_type=jnp.float32) + tr_b_ref[...]
    h = _gelu(h)
    h = _layernorm(h, ln_g_ref[...], ln_b_ref[...])
    o_ref[...] = jnp.dot(h.astype(jnp.bfloat16), dec_w_ref[...],
                         preferred_element_type=jnp.float32) + dec_b_ref[...]


def mlm_head(x, p):
    """x: (M, H) bf16.  Single full-M tile (M = B*S is tiny at toy dims)."""
    M, H = x.shape
    V = p["dec_w"].shape[1]
    # TODO(synk): at real vocab (30522) add a vocab grid axis with 256-512 wide
    # lane-dense dec_w / output tiles and a 256-512 row tile over M.
    flops = 2 * M * H * H + 2 * M * H * V
    bytes_accessed = int(M * H * 2 + M * V * 4 + (H * H + H * V) * 2 + (3 * H + V) * 4)
    return pl.pallas_call(
        _mlm_head_kernel,
        out_shape=jax.ShapeDtypeStruct((M, V), jnp.float32),
        grid=(1,),
        in_specs=[
            pl.BlockSpec((M, H), lambda i: (0, 0)),
            pl.BlockSpec((H, H), lambda i: (0, 0)),          # transform w (bf16)
            pl.BlockSpec((1, H), lambda i: (0, 0)),
            pl.BlockSpec((1, H), lambda i: (0, 0)),
            pl.BlockSpec((1, H), lambda i: (0, 0)),
            pl.BlockSpec((H, V), lambda i: (0, 0)),          # tied decoder w (bf16)
            pl.BlockSpec((1, V), lambda i: (0, 0)),
        ],
        out_specs=pl.BlockSpec((M, V), lambda i: (0, 0)),    # VOCAB=128: lane-dense stores
        compiler_params=pltpu.CompilerParams(
            dimension_semantics=("arbitrary",),
            vmem_limit_bytes=_VMEM_LIMIT),
        cost_estimate=pl.CostEstimate(flops=flops, transcendentals=M * H,
                                      bytes_accessed=bytes_accessed),
    )(x, p["tr_w"], p["tr_b"].reshape(1, H), p["tr_ln_g"].reshape(1, H),
      p["tr_ln_b"].reshape(1, H), p["dec_w"], p["dec_b"].reshape(1, V))


# -------------------- parameter init (deterministic, synthetic) --------------------

def init_params(key):
    keys = iter(jax.random.split(key, 128))

    def nrm(shape):
        return jax.random.normal(next(keys), shape, jnp.float32) * 0.02

    p = {
        "word_emb": nrm((VOCAB, HIDDEN)),
        "pos_emb": nrm((MAX_POS, HIDDEN)),
        "tok_type_emb": nrm((2, HIDDEN)),
        "emb_ln_g": jnp.ones((HIDDEN,), jnp.float32),
        "emb_ln_b": jnp.zeros((HIDDEN,), jnp.float32),
        "layers": [],
    }
    for _ in range(N_LAYERS):
        q_w, k_w, v_w = nrm((HIDDEN, HIDDEN)), nrm((HIDDEN, HIDDEN)), nrm((HIDDEN, HIDDEN))
        p["layers"].append(dict(
            # Q/K/V fused into one (H, 3H) bf16 matmul (weights DMA'd once, 1 MXU call).
            qkv_w=jnp.concatenate([q_w, k_w, v_w], axis=1).astype(jnp.bfloat16),
            qkv_b=jnp.zeros((3 * HIDDEN,), jnp.float32),
            ao_w=nrm((HIDDEN, HIDDEN)).astype(jnp.bfloat16),
            ao_b=jnp.zeros((HIDDEN,), jnp.float32),
            ln1_g=jnp.ones((HIDDEN,), jnp.float32), ln1_b=jnp.zeros((HIDDEN,), jnp.float32),
            i_w=nrm((HIDDEN, INTERMEDIATE)).astype(jnp.bfloat16),
            i_b=jnp.zeros((INTERMEDIATE,), jnp.float32),
            o_w=nrm((INTERMEDIATE, HIDDEN)).astype(jnp.bfloat16),
            o_b=jnp.zeros((HIDDEN,), jnp.float32),
            ln2_g=jnp.ones((HIDDEN,), jnp.float32), ln2_b=jnp.zeros((HIDDEN,), jnp.float32),
        ))
    # BertOnlyMLMHead: transform dense + gelu + LN, then decoder (tied to word_emb) + bias
    p["tr_w"] = nrm((HIDDEN, HIDDEN)).astype(jnp.bfloat16)
    p["tr_b"] = jnp.zeros((HIDDEN,), jnp.float32)
    p["tr_ln_g"] = jnp.ones((HIDDEN,), jnp.float32)
    p["tr_ln_b"] = jnp.zeros((HIDDEN,), jnp.float32)
    p["dec_w"] = p["word_emb"].T.astype(jnp.bfloat16)   # weight tying, (HIDDEN, VOCAB)
    p["dec_b"] = jnp.zeros((VOCAB,), jnp.float32)
    return p


# -------------------- forward pass --------------------

def bert_for_masked_lm(params, input_ids, attention_mask=None, position_ids=None, labels=None):
    """Returns (loss, prediction_scores, last_hidden_state) like the PyTorch module."""
    B, S = input_ids.shape
    if position_ids is None:
        position_ids = jnp.broadcast_to(jnp.arange(S, dtype=jnp.int32), (B, S))
    if attention_mask is None:
        attention_mask = jnp.ones((B, S), jnp.float32)

    # Embeddings: gathers + adds are plain-JAX glue; the embedding LayerNorm is fused
    # into the first BertLayer kernel (no separate LN kernel / HBM round-trip).
    # TODO(synk): token_type_ids not exposed by the reference forward -> segment 0 only.
    emb = (params["word_emb"][input_ids]
           + params["pos_emb"][position_ids]
           + params["tok_type_emb"][0][None, None, :])
    x = emb.reshape(B * S, HIDDEN).astype(jnp.float32)

    # Additive attention mask, (B, 1, S); broadcast over heads inside the kernel.
    mask_add = ((1.0 - attention_mask.astype(jnp.float32)) * -10000.0).reshape(B, 1, S)

    for li, L in enumerate(params["layers"]):
        x = bert_layer(x, mask_add, L, B, S,
                       apply_input_ln=(li == 0),
                       in_ln_g=params["emb_ln_g"], in_ln_b=params["emb_ln_b"])
    sequence_output = x.astype(jnp.float32).reshape(B, S, HIDDEN)

    # Fused MLM head (transform + GELU + LN + tied decoder), lane-dense logits.
    logits = mlm_head(x, params).reshape(B, S, VOCAB)

    loss = None
    if labels is not None:
        # CrossEntropyLoss (ignore_index=-100, mean over valid tokens) — small reduction in JAX glue.
        flat_logits = logits.reshape(-1, VOCAB)
        flat_labels = labels.reshape(-1)
        valid = flat_labels != -100
        safe = jnp.where(valid, flat_labels, 0)
        logp = jax.nn.log_softmax(flat_logits, axis=-1)
        nll = -jnp.take_along_axis(logp, safe[:, None], axis=-1)[:, 0]
        loss = jnp.sum(jnp.where(valid, nll, 0.0)) / jnp.maximum(jnp.sum(valid.astype(jnp.float32)), 1.0)

    return loss, logits, sequence_output


# -------------------- main --------------------

if __name__ == "__main__":
    key = jax.random.PRNGKey(0)
    k_param, k_ids, k_mask, k_lbl = jax.random.split(key, 4)

    B, S = 2, 8
    params = init_params(k_param)

    input_ids = jax.random.randint(k_ids, (B, S), 0, VOCAB, dtype=jnp.int32)
    attention_mask = jnp.concatenate(
        [jnp.ones((B, S - 2), jnp.float32), jnp.zeros((B, 2), jnp.float32)], axis=1)
    labels = jax.random.randint(k_lbl, (B, S), 0, VOCAB, dtype=jnp.int32)

    loss, logits, last_hidden = bert_for_masked_lm(
        params, input_ids, attention_mask=attention_mask, labels=labels)

    jax.block_until_ready((loss, logits, last_hidden))
    assert logits.shape == (B, S, VOCAB)
    assert last_hidden.shape == (B, S, HIDDEN)
    assert bool(jnp.isfinite(loss)) and bool(jnp.all(jnp.isfinite(logits)))
    print("KERNEL_OK")
</pallas_src>

<mosaic_0001>
module attributes {stable_mosaic.version = 11 : i64} {
  func.func @_bert_layer_kernel(%arg0: i32, %arg1: memref<8x32xf32, #tpu.memory_space<vmem>>, %arg2: memref<1x1x8xf32, #tpu.memory_space<vmem>>, %arg3: memref<1x32xf32, #tpu.memory_space<vmem>>, %arg4: memref<1x32xf32, #tpu.memory_space<vmem>>, %arg5: memref<32x96xbf16, #tpu.memory_space<vmem>>, %arg6: memref<1x96xf32, #tpu.memory_space<vmem>>, %arg7: memref<32x32xbf16, #tpu.memory_space<vmem>>, %arg8: memref<1x32xf32, #tpu.memory_space<vmem>>, %arg9: memref<1x32xf32, #tpu.memory_space<vmem>>, %arg10: memref<1x32xf32, #tpu.memory_space<vmem>>, %arg11: memref<32x64xbf16, #tpu.memory_space<vmem>>, %arg12: memref<1x64xf32, #tpu.memory_space<vmem>>, %arg13: memref<64x32xbf16, #tpu.memory_space<vmem>>, %arg14: memref<1x32xf32, #tpu.memory_space<vmem>>, %arg15: memref<1x32xf32, #tpu.memory_space<vmem>>, %arg16: memref<1x32xf32, #tpu.memory_space<vmem>>, %arg17: memref<8x32xbf16, #tpu.memory_space<vmem>>) attributes {dimension_semantics = [#tpu.dimension_semantics<parallel>], iteration_bounds = array<i64: 2>, scalar_prefetch = 0 : i64, scratch_operands = 0 : i64, tpu.core_type = #tpu.core_type<tc>, window_params = [{transform_indices = @transform_0, window_bounds = array<i64: 8, 32>}, {transform_indices = @transform_1, window_bounds = array<i64: 1, 1, 8>}, {pipeline_mode = #tpu.pipeline_mode<synchronous>, transform_indices = @transform_2, window_bounds = array<i64: 1, 32>}, {pipeline_mode = #tpu.pipeline_mode<synchronous>, transform_indices = @transform_3, window_bounds = array<i64: 1, 32>}, {pipeline_mode = #tpu.pipeline_mode<synchronous>, transform_indices = @transform_4, window_bounds = array<i64: 32, 96>}, {pipeline_mode = #tpu.pipeline_mode<synchronous>, transform_indices = @transform_5, window_bounds = array<i64: 1, 96>}, {pipeline_mode = #tpu.pipeline_mode<synchronous>, transform_indices = @transform_6, window_bounds = array<i64: 32, 32>}, {pipeline_mode = #tpu.pipeline_mode<synchronous>, transform_indices = @transform_7, window_bounds = array<i64: 1, 32>}, {pipeline_mode = #tpu.pipeline_mode<synchronous>, transform_indices = @transform_8, window_bounds = array<i64: 1, 32>}, {pipeline_mode = #tpu.pipeline_mode<synchronous>, transform_indices = @transform_9, window_bounds = array<i64: 1, 32>}, {pipeline_mode = #tpu.pipeline_mode<synchronous>, transform_indices = @transform_10, window_bounds = array<i64: 32, 64>}, {pipeline_mode = #tpu.pipeline_mode<synchronous>, transform_indices = @transform_11, window_bounds = array<i64: 1, 64>}, {pipeline_mode = #tpu.pipeline_mode<synchronous>, transform_indices = @transform_12, window_bounds = array<i64: 64, 32>}, {pipeline_mode = #tpu.pipeline_mode<synchronous>, transform_indices = @transform_13, window_bounds = array<i64: 1, 32>}, {pipeline_mode = #tpu.pipeline_mode<synchronous>, transform_indices = @transform_14, window_bounds = array<i64: 1, 32>}, {pipeline_mode = #tpu.pipeline_mode<synchronous>, transform_indices = @transform_15, window_bounds = array<i64: 1, 32>}, {transform_indices = @transform_16, window_bounds = array<i64: 8, 32>}]} {
    %c0 = arith.constant 0 : index
    %c0_0 = arith.constant 0 : index
    %0 = vector.load %arg1[%c0, %c0_0] : memref<8x32xf32, #tpu.memory_space<vmem>>, vector<8x32xf32>
    %c0_1 = arith.constant 0 : index
    %c0_2 = arith.constant 0 : index
    %1 = vector.load %arg3[%c0_1, %c0_2] : memref<1x32xf32, #tpu.memory_space<vmem>>, vector<1x32xf32>
    %c0_3 = arith.constant 0 : index
    %c0_4 = arith.constant 0 : index
    %2 = vector.load %arg4[%c0_3, %c0_4] : memref<1x32xf32, #tpu.memory_space<vmem>>, vector<1x32xf32>
    %cst = arith.constant dense<0.000000e+00> : vector<8xf32>
    %3 = vector.multi_reduction <add>, %0, %cst [1] : vector<8x32xf32> to vector<8xf32>
    %4 = vector.shape_cast %3 : vector<8xf32> to vector<8x1xf32>
    %cst_5 = arith.constant 3.200000e+01 : f32
    %5 = vector.broadcast %cst_5 : f32 to vector<8x1xf32>
    %6 = arith.divf %4, %5 : vector<8x1xf32>
    %7 = vector.broadcast %6 : vector<8x1xf32> to vector<8x32xf32>
    %8 = arith.subf %0, %7 : vector<8x32xf32>
    %9 = arith.mulf %8, %8 : vector<8x32xf32>
    %cst_6 = arith.constant dense<0.000000e+00> : vector<8xf32>
    %10 = vector.multi_reduction <add>, %9, %cst_6 [1] : vector<8x32xf32> to vector<8xf32>
    %11 = vector.shape_cast %10 : vector<8xf32> to vector<8x1xf32>
    %cst_7 = arith.constant 3.200000e+01 : f32
    %12 = vector.broadcast %cst_7 : f32 to vector<8x1xf32>
    %13 = arith.divf %11, %12 : vector<8x1xf32>
    %14 = vector.broadcast %6 : vector<8x1xf32> to vector<8x32xf32>
    %15 = arith.subf %0, %14 : vector<8x32xf32>
    %cst_8 = arith.constant 9.99999996E-13 : f32
    %16 = vector.broadcast %cst_8 : f32 to vector<8x1xf32>
    %17 = arith.addf %13, %16 : vector<8x1xf32>
    %18 = math.rsqrt %17 : vector<8x1xf32>
    %19 = vector.broadcast %18 : vector<8x1xf32> to vector<8x32xf32>
    %20 = arith.mulf %15, %19 : vector<8x32xf32>
    %21 = vector.broadcast %1 : vector<1x32xf32> to vector<8x32xf32>
    %22 = arith.mulf %20, %21 : vector<8x32xf32>
    %23 = vector.broadcast %2 : vector<1x32xf32> to vector<8x32xf32>
    %24 = arith.addf %22, %23 : vector<8x32xf32>
    %25 = arith.truncf %24 : vector<8x32xf32> to vector<8x32xbf16>
    %c0_9 = arith.constant 0 : index
    %c0_10 = arith.constant 0 : index
    %26 = vector.load %arg5[%c0_9, %c0_10] : memref<32x96xbf16, #tpu.memory_space<vmem>>, vector<32x96xbf16>
    %cst_11 = arith.constant dense<0.000000e+00> : vector<8x96xf32>
    %27 = tpu.matmul %25, %26, %cst_11 {dimension_numbers = #tpu.dot_dimension_numbers<[1], [0], [0], [1], [0, 0, 1, 1], [], []>} : vector<8x32xbf16>, vector<32x96xbf16>, vector<8x96xf32> -> vector<8x96xf32>
    %c0_12 = arith.constant 0 : index
    %c0_13 = arith.constant 0 : index
    %28 = vector.load %arg6[%c0_12, %c0_13] : memref<1x96xf32, #tpu.memory_space<vmem>>, vector<1x96xf32>
    %29 = vector.broadcast %28 : vector<1x96xf32> to vector<8x96xf32>
    %30 = arith.addf %27, %29 : vector<8x96xf32>
    %c0_14 = arith.constant 0 : index
    %c0_15 = arith.constant 0 : index
    %c0_16 = arith.constant 0 : index
    %31 = vector.load %arg2[%c0_14, %c0_15, %c0_16] : memref<1x1x8xf32, #tpu.memory_space<vmem>>, vector<1x1x8xf32>
    %32 = vector.shape_cast %31 : vector<1x1x8xf32> to vector<1x8xf32>
    %33 = vector.extract_strided_slice %30 {offsets = [0, 0], sizes = [8, 32], strides = [1, 1]} : vector<8x96xf32> to vector<8x32xf32>
    %cst_17 = arith.constant 0.353553385 : f32
    %34 = vector.broadcast %cst_17 : f32 to vector<8x32xf32>
    %35 = arith.mulf %33, %34 : vector<8x32xf32>
    %36 = arith.truncf %35 : vector<8x32xf32> to vector<8x32xbf16>
    %37 = vector.extract_strided_slice %30 {offsets = [0, 32], sizes = [8, 32], strides = [1, 1]} : vector<8x96xf32> to vector<8x32xf32>
    %38 = arith.truncf %37 : vector<8x32xf32> to vector<8x32xbf16>
    %39 = vector.extract_strided_slice %30 {offsets = [0, 64], sizes = [8, 32], strides = [1, 1]} : vector<8x96xf32> to vector<8x32xf32>
    %40 = arith.truncf %39 : vector<8x32xf32> to vector<8x32xbf16>
    %41 = vector.extract_strided_slice %36 {offsets = [0, 0], sizes = [8, 8], strides = [1, 1]} : vector<8x32xbf16> to vector<8x8xbf16>
    %42 = vector.extract_strided_slice %38 {offsets = [0, 0], sizes = [8, 8], strides = [1, 1]} : vector<8x32xbf16> to vector<8x8xbf16>
    %43 = vector.extract_strided_slice %40 {offsets = [0, 0], sizes = [8, 8], strides = [1, 1]} : vector<8x32xbf16> to vector<8x8xbf16>
    %cst_18 = arith.constant dense<0.000000e+00> : vector<8x8xf32>
    %44 = tpu.matmul %41, %42, %cst_18 {dimension_numbers = #tpu.dot_dimension_numbers<[1], [1], [0], [0], [0, 0, 1, 0], [], []>} : vector<8x8xbf16>, vector<8x8xbf16>, vector<8x8xf32> -> vector<8x8xf32>
    %45 = vector.broadcast %32 : vector<1x8xf32> to vector<8x8xf32>
    %46 = arith.addf %44, %45 : vector<8x8xf32>
    %cst_19 = arith.constant dense<0xFF800000> : vector<8xf32>
    %47 = vector.multi_reduction <maximumf>, %46, %cst_19 [1] : vector<8x8xf32> to vector<8xf32>
    %48 = vector.shape_cast %47 : vector<8xf32> to vector<8x1xf32>
    %49 = vector.broadcast %48 : vector<8x1xf32> to vector<8x8xf32>
    %50 = arith.subf %46, %49 : vector<8x8xf32>
    %51 = math.exp %50 : vector<8x8xf32>
    %cst_20 = arith.constant dense<0.000000e+00> : vector<8xf32>
    %52 = vector.multi_reduction <add>, %51, %cst_20 [1] : vector<8x8xf32> to vector<8xf32>
    %53 = vector.shape_cast %52 : vector<8xf32> to vector<8x1xf32>
    %54 = tpu.reciprocal %53 {approx = true} : vector<8x1xf32> -> vector<8x1xf32>
    %55 = vector.broadcast %54 : vector<8x1xf32> to vector<8x8xf32>
    %56 = arith.mulf %51, %55 : vector<8x8xf32>
    %57 = arith.truncf %56 : vector<8x8xf32> to vector<8x8xbf16>
    %cst_21 = arith.constant dense<0.000000e+00> : vector<8x8xf32>
    %58 = tpu.matmul %57, %43, %cst_21 {dimension_numbers = #tpu.dot_dimension_numbers<[1], [0], [0], [1], [0, 0, 1, 1], [], []>} : vector<8x8xbf16>, vector<8x8xbf16>, vector<8x8xf32> -> vector<8x8xf32>
    %59 = vector.extract_strided_slice %36 {offsets = [0, 8], sizes = [8, 8], strides = [1, 1]} : vector<8x32xbf16> to vector<8x8xbf16>
    %60 = vector.extract_strided_slice %38 {offsets = [0, 8], sizes = [8, 8], strides = [1, 1]} : vector<8x32xbf16> to vector<8x8xbf16>
    %61 = vector.extract_strided_slice %40 {offsets = [0, 8], sizes = [8, 8], strides = [1, 1]} : vector<8x32xbf16> to vector<8x8xbf16>
    %cst_22 = arith.constant dense<0.000000e+00> : vector<8x8xf32>
    %62 = tpu.matmul %59, %60, %cst_22 {dimension_numbers = #tpu.dot_dimension_numbers<[1], [1], [0], [0], [0, 0, 1, 0], [], []>} : vector<8x8xbf16>, vector<8x8xbf16>, vector<8x8xf32> -> vector<8x8xf32>
    %63 = vector.broadcast %32 : vector<1x8xf32> to vector<8x8xf32>
    %64 = arith.addf %62, %63 : vector<8x8xf32>
    %cst_23 = arith.constant dense<0xFF800000> : vector<8xf32>
    %65 = vector.multi_reduction <maximumf>, %64, %cst_23 [1] : vector<8x8xf32> to vector<8xf32>
    %66 = vector.shape_cast %65 : vector<8xf32> to vector<8x1xf32>
    %67 = vector.broadcast %66 : vector<8x1xf32> to vector<8x8xf32>
    %68 = arith.subf %64, %67 : vector<8x8xf32>
    %69 = math.exp %68 : vector<8x8xf32>
    %cst_24 = arith.constant dense<0.000000e+00> : vector<8xf32>
    %70 = vector.multi_reduction <add>, %69, %cst_24 [1] : vector<8x8xf32> to vector<8xf32>
    %71 = vector.shape_cast %70 : vector<8xf32> to vector<8x1xf32>
    %72 = tpu.reciprocal %71 {approx = true} : vector<8x1xf32> -> vector<8x1xf32>
    %73 = vector.broadcast %72 : vector<8x1xf32> to vector<8x8xf32>
    %74 = arith.mulf %69, %73 : vector<8x8xf32>
    %75 = arith.truncf %74 : vector<8x8xf32> to vector<8x8xbf16>
    %cst_25 = arith.constant dense<0.000000e+00> : vector<8x8xf32>
    %76 = tpu.matmul %75, %61, %cst_25 {dimension_numbers = #tpu.dot_dimension_numbers<[1], [0], [0], [1], [0, 0, 1, 1], [], []>} : vector<8x8xbf16>, vector<8x8xbf16>, vector<8x8xf32> -> vector<8x8xf32>
    %77 = vector.extract_strided_slice %36 {offsets = [0, 16], sizes = [8, 8], strides = [1, 1]} : vector<8x32xbf16> to vector<8x8xbf16>
    %78 = vector.extract_strided_slice %38 {offsets = [0, 16], sizes = [8, 8], strides = [1, 1]} : vector<8x32xbf16> to vector<8x8xbf16>
    %79 = vector.extract_strided_slice %40 {offsets = [0, 16], sizes = [8, 8], strides = [1, 1]} : vector<8x32xbf16> to vector<8x8xbf16>
    %cst_26 = arith.constant dense<0.000000e+00> : vector<8x8xf32>
    %80 = tpu.matmul %77, %78, %cst_26 {dimension_numbers = #tpu.dot_dimension_numbers<[1], [1], [0], [0], [0, 0, 1, 0], [], []>} : vector<8x8xbf16>, vector<8x8xbf16>, vector<8x8xf32> -> vector<8x8xf32>
    %81 = vector.broadcast %32 : vector<1x8xf32> to vector<8x8xf32>
    %82 = arith.addf %80, %81 : vector<8x8xf32>
    %cst_27 = arith.constant dense<0xFF800000> : vector<8xf32>
    %83 = vector.multi_reduction <maximumf>, %82, %cst_27 [1] : vector<8x8xf32> to vector<8xf32>
    %84 = vector.shape_cast %83 : vector<8xf32> to vector<8x1xf32>
    %85 = vector.broadcast %84 : vector<8x1xf32> to vector<8x8xf32>
    %86 = arith.subf %82, %85 : vector<8x8xf32>
    %87 = math.exp %86 : vector<8x8xf32>
    %cst_28 = arith.constant dense<0.000000e+00> : vector<8xf32>
    %88 = vector.multi_reduction <add>, %87, %cst_28 [1] : vector<8x8xf32> to vector<8xf32>
    %89 = vector.shape_cast %88 : vector<8xf32> to vector<8x1xf32>
    %90 = tpu.reciprocal %89 {approx = true} : vector<8x1xf32> -> vector<8x1xf32>
    %91 = vector.broadcast %90 : vector<8x1xf32> to vector<8x8xf32>
    %92 = arith.mulf %87, %91 : vector<8x8xf32>
    %93 = arith.truncf %92 : vector<8x8xf32> to vector<8x8xbf16>
    %cst_29 = arith.constant dense<0.000000e+00> : vector<8x8xf32>
    %94 = tpu.matmul %93, %79, %cst_29 {dimension_numbers = #tpu.dot_dimension_numbers<[1], [0], [0], [1], [0, 0, 1, 1], [], []>} : vector<8x8xbf16>, vector<8x8xbf16>, vector<8x8xf32> -> vector<8x8xf32>
    %95 = vector.extract_strided_slice %36 {offsets = [0, 24], sizes = [8, 8], strides = [1, 1]} : vector<8x32xbf16> to vector<8x8xbf16>
    %96 = vector.extract_strided_slice %38 {offsets = [0, 24], sizes = [8, 8], strides = [1, 1]} : vector<8x32xbf16> to vector<8x8xbf16>
    %97 = vector.extract_strided_slice %40 {offsets = [0, 24], sizes = [8, 8], strides = [1, 1]} : vector<8x32xbf16> to vector<8x8xbf16>
    %cst_30 = arith.constant dense<0.000000e+00> : vector<8x8xf32>
    %98 = tpu.matmul %95, %96, %cst_30 {dimension_numbers = #tpu.dot_dimension_numbers<[1], [1], [0], [0], [0, 0, 1, 0], [], []>} : vector<8x8xbf16>, vector<8x8xbf16>, vector<8x8xf32> -> vector<8x8xf32>
    %99 = vector.broadcast %32 : vector<1x8xf32> to vector<8x8xf32>
    %100 = arith.addf %98, %99 : vector<8x8xf32>
    %cst_31 = arith.constant dense<0xFF800000> : vector<8xf32>
    %101 = vector.multi_reduction <maximumf>, %100, %cst_31 [1] : vector<8x8xf32> to vector<8xf32>
    %102 = vector.shape_cast %101 : vector<8xf32> to vector<8x1xf32>
    %103 = vector.broadcast %102 : vector<8x1xf32> to vector<8x8xf32>
    %104 = arith.subf %100, %103 : vector<8x8xf32>
    %105 = math.exp %104 : vector<8x8xf32>
    %cst_32 = arith.constant dense<0.000000e+00> : vector<8xf32>
    %106 = vector.multi_reduction <add>, %105, %cst_32 [1] : vector<8x8xf32> to vector<8xf32>
    %107 = vector.shape_cast %106 : vector<8xf32> to vector<8x1xf32>
    %108 = tpu.reciprocal %107 {approx = true} : vector<8x1xf32> -> vector<8x1xf32>
    %109 = vector.broadcast %108 : vector<8x1xf32> to vector<8x8xf32>
    %110 = arith.mulf %105, %109 : vector<8x8xf32>
    %111 = arith.truncf %110 : vector<8x8xf32> to vector<8x8xbf16>
    %cst_33 = arith.constant dense<0.000000e+00> : vector<8x8xf32>
    %112 = tpu.matmul %111, %97, %cst_33 {dimension_numbers = #tpu.dot_dimension_numbers<[1], [0], [0], [1], [0, 0, 1, 1], [], []>} : vector<8x8xbf16>, vector<8x8xbf16>, vector<8x8xf32> -> vector<8x8xf32>
    %113 = tpu.concatenate %58, %76, %94, %112 in 1 : vector<8x8xf32>, vector<8x8xf32>, vector<8x8xf32>, vector<8x8xf32> -> vector<8x32xf32>
    %114 = arith.truncf %113 : vector<8x32xf32> to vector<8x32xbf16>
    %c0_34 = arith.constant 0 : index
    %c0_35 = arith.constant 0 : index
    %115 = vector.load %arg7[%c0_34, %c0_35] : memref<32x32xbf16, #tpu.memory_space<vmem>>, vector<32x32xbf16>
    %cst_36 = arith.constant dense<0.000000e+00> : vector<8x32xf32>
    %116 = tpu.matmul %114, %115, %cst_36 {dimension_numbers = #tpu.dot_dimension_numbers<[1], [0], [0], [1], [0, 0, 1, 1], [], []>} : vector<8x32xbf16>, vector<32x32xbf16>, vector<8x32xf32> -> vector<8x32xf32>
    %c0_37 = arith.constant 0 : index
    %c0_38 = arith.constant 0 : index
    %117 = vector.load %arg8[%c0_37, %c0_38] : memref<1x32xf32, #tpu.memory_space<vmem>>, vector<1x32xf32>
    %118 = vector.broadcast %117 : vector<1x32xf32> to vector<8x32xf32>
    %119 = arith.addf %116, %118 : vector<8x32xf32>
    %120 = arith.addf %119, %24 : vector<8x32xf32>
    %c0_39 = arith.constant 0 : index
    %c0_40 = arith.constant 0 : index
    %121 = vector.load %arg9[%c0_39, %c0_40] : memref<1x32xf32, #tpu.memory_space<vmem>>, vector<1x32xf32>
    %c0_41 = arith.constant 0 : index
    %c0_42 = arith.constant 0 : index
    %122 = vector.load %arg10[%c0_41, %c0_42] : memref<1x32xf32, #tpu.memory_space<vmem>>, vector<1x32xf32>
    %cst_43 = arith.constant dense<0.000000e+00> : vector<8xf32>
    %123 = vector.multi_reduction <add>, %120, %cst_43 [1] : vector<8x32xf32> to vector<8xf32>
    %124 = vector.shape_cast %123 : vector<8xf32> to vector<8x1xf32>
    %cst_44 = arith.constant 3.200000e+01 : f32
    %125 = vector.broadcast %cst_44 : f32 to vector<8x1xf32>
    %126 = arith.divf %124, %125 : vector<8x1xf32>
    %127 = vector.broadcast %126 : vector<8x1xf32> to vector<8x32xf32>
    %128 = arith.subf %120, %127 : vector<8x32xf32>
    %129 = arith.mulf %128, %128 : vector<8x32xf32>
    %cst_45 = arith.constant dense<0.000000e+00> : vector<8xf32>
    %130 = vector.multi_reduction <add>, %129, %cst_45 [1] : vector<8x32xf32> to vector<8xf32>
    %131 = vector.shape_cast %130 : vector<8xf32> to vector<8x1xf32>
    %cst_46 = arith.constant 3.200000e+01 : f32
    %132 = vector.broadcast %cst_46 : f32 to vector<8x1xf32>
    %133 = arith.divf %131, %132 : vector<8x1xf32>
    %134 = vector.broadcast %126 : vector<8x1xf32> to vector<8x32xf32>
    %135 = arith.subf %120, %134 : vector<8x32xf32>
    %cst_47 = arith.constant 9.99999996E-13 : f32
    %136 = vector.broadcast %cst_47 : f32 to vector<8x1xf32>
    %137 = arith.addf %133, %136 : vector<8x1xf32>
    %138 = math.rsqrt %137 : vector<8x1xf32>
    %139 = vector.broadcast %138 : vector<8x1xf32> to vector<8x32xf32>
    %140 = arith.mulf %135, %139 : vector<8x32xf32>
    %141 = vector.broadcast %121 : vector<1x32xf32> to vector<8x32xf32>
    %142 = arith.mulf %140, %141 : vector<8x32xf32>
    %143 = vector.broadcast %122 : vector<1x32xf32> to vector<8x32xf32>
    %144 = arith.addf %142, %143 : vector<8x32xf32>
    %145 = arith.truncf %144 : vector<8x32xf32> to vector<8x32xbf16>
    %c0_48 = arith.constant 0 : index
    %c0_49 = arith.constant 0 : index
    %146 = vector.load %arg11[%c0_48, %c0_49] : memref<32x64xbf16, #tpu.memory_space<vmem>>, vector<32x64xbf16>
    %cst_50 = arith.constant dense<0.000000e+00> : vector<8x64xf32>
    %147 = tpu.matmul %145, %146, %cst_50 {dimension_numbers = #tpu.dot_dimension_numbers<[1], [0], [0], [1], [0, 0, 1, 1], [], []>} : vector<8x32xbf16>, vector<32x64xbf16>, vector<8x64xf32> -> vector<8x64xf32>
    %c0_51 = arith.constant 0 : index
    %c0_52 = arith.constant 0 : index
    %148 = vector.load %arg12[%c0_51, %c0_52] : memref<1x64xf32, #tpu.memory_space<vmem>>, vector<1x64xf32>
    %149 = vector.broadcast %148 : vector<1x64xf32> to vector<8x64xf32>
    %150 = arith.addf %147, %149 : vector<8x64xf32>
    %cst_53 = arith.constant 5.000000e-01 : f32
    %151 = vector.broadcast %cst_53 : f32 to vector<8x64xf32>
    %152 = arith.mulf %151, %150 : vector<8x64xf32>
    %cst_54 = arith.constant 0.707106769 : f32
    %153 = vector.broadcast %cst_54 : f32 to vector<8x64xf32>
    %154 = arith.mulf %150, %153 : vector<8x64xf32>
    %155 = math.absf %154 : vector<8x64xf32>
    %cst_55 = arith.constant 0.327591091 : f32
    %156 = vector.broadcast %cst_55 : f32 to vector<8x64xf32>
    %157 = arith.mulf %156, %155 : vector<8x64xf32>
    %cst_56 = arith.constant 1.000000e+00 : f32
    %158 = vector.broadcast %cst_56 : f32 to vector<8x64xf32>
    %159 = arith.addf %158, %157 : vector<8x64xf32>
    %160 = tpu.reciprocal %159 {approx = true} : vector<8x64xf32> -> vector<8x64xf32>
    %cst_57 = arith.constant 1.06140542 : f32
    %161 = vector.broadcast %cst_57 : f32 to vector<8x64xf32>
    %162 = arith.mulf %161, %160 : vector<8x64xf32>
    %cst_58 = arith.constant -1.45315206 : f32
    %163 = vector.broadcast %cst_58 : f32 to vector<8x64xf32>
    %164 = arith.addf %162, %163 : vector<8x64xf32>
    %165 = arith.mulf %164, %160 : vector<8x64xf32>
    %cst_59 = arith.constant 1.42141378 : f32
    %166 = vector.broadcast %cst_59 : f32 to vector<8x64xf32>
    %167 = arith.addf %165, %166 : vector<8x64xf32>
    %168 = arith.mulf %167, %160 : vector<8x64xf32>
    %cst_60 = arith.constant -0.284496725 : f32
    %169 = vector.broadcast %cst_60 : f32 to vector<8x64xf32>
    %170 = arith.addf %168, %169 : vector<8x64xf32>
    %171 = arith.mulf %170, %160 : vector<8x64xf32>
    %cst_61 = arith.constant 0.254829586 : f32
    %172 = vector.broadcast %cst_61 : f32 to vector<8x64xf32>
    %173 = arith.addf %171, %172 : vector<8x64xf32>
    %174 = arith.mulf %173, %160 : vector<8x64xf32>
    %cst_62 = arith.constant 0.000000e+00 : f32
    %175 = vector.broadcast %cst_62 : f32 to vector<8x64xf32>
    %176 = arith.subf %175, %155 : vector<8x64xf32>
    %177 = arith.mulf %176, %155 : vector<8x64xf32>
    %178 = math.exp %177 : vector<8x64xf32>
    %179 = arith.mulf %174, %178 : vector<8x64xf32>
    %cst_63 = arith.constant 1.000000e+00 : f32
    %180 = vector.broadcast %cst_63 : f32 to vector<8x64xf32>
    %181 = arith.subf %180, %179 : vector<8x64xf32>
    %cst_64 = arith.constant 0.000000e+00 : f32
    %182 = vector.broadcast %cst_64 : f32 to vector<8x64xf32>
    %183 = arith.cmpf oge, %154, %182 : vector<8x64xf32>
    %cst_65 = arith.constant 0.000000e+00 : f32
    %184 = vector.broadcast %cst_65 : f32 to vector<8x64xf32>
    %185 = arith.subf %184, %181 : vector<8x64xf32>
    %186 = arith.select %183, %181, %185 : vector<8x64xi1>, vector<8x64xf32>
    %cst_66 = arith.constant 1.000000e+00 : f32
    %187 = vector.broadcast %cst_66 : f32 to vector<8x64xf32>
    %188 = arith.addf %187, %186 : vector<8x64xf32>
    %189 = arith.mulf %152, %188 : vector<8x64xf32>
    %190 = arith.truncf %189 : vector<8x64xf32> to vector<8x64xbf16>
    %c0_67 = arith.constant 0 : index
    %c0_68 = arith.constant 0 : index
    %191 = vector.load %arg13[%c0_67, %c0_68] : memref<64x32xbf16, #tpu.memory_space<vmem>>, vector<64x32xbf16>
    %cst_69 = arith.constant dense<0.000000e+00> : vector<8x32xf32>
    %192 = tpu.matmul %190, %191, %cst_69 {dimension_numbers = #tpu.dot_dimension_numbers<[1], [0], [0], [1], [0, 0, 1, 1], [], []>} : vector<8x64xbf16>, vector<64x32xbf16>, vector<8x32xf32> -> vector<8x32xf32>
    %c0_70 = arith.constant 0 : index
    %c0_71 = arith.constant 0 : index
    %193 = vector.load %arg14[%c0_70, %c0_71] : memref<1x32xf32, #tpu.memory_space<vmem>>, vector<1x32xf32>
    %194 = vector.broadcast %193 : vector<1x32xf32> to vector<8x32xf32>
    %195 = arith.addf %192, %194 : vector<8x32xf32>
    %196 = arith.addf %195, %144 : vector<8x32xf32>
    %c0_72 = arith.constant 0 : index
    %c0_73 = arith.constant 0 : index
    %197 = vector.load %arg15[%c0_72, %c0_73] : memref<1x32xf32, #tpu.memory_space<vmem>>, vector<1x32xf32>
    %c0_74 = arith.constant 0 : index
    %c0_75 = arith.constant 0 : index
    %198 = vector.load %arg16[%c0_74, %c0_75] : memref<1x32xf32, #tpu.memory_space<vmem>>, vector<1x32xf32>
    %cst_76 = arith.constant dense<0.000000e+00> : vector<8xf32>
    %199 = vector.multi_reduction <add>, %196, %cst_76 [1] : vector<8x32xf32> to vector<8xf32>
    %200 = vector.shape_cast %199 : vector<8xf32> to vector<8x1xf32>
    %cst_77 = arith.constant 3.200000e+01 : f32
    %201 = vector.broadcast %cst_77 : f32 to vector<8x1xf32>
    %202 = arith.divf %200, %201 : vector<8x1xf32>
    %203 = vector.broadcast %202 : vector<8x1xf32> to vector<8x32xf32>
    %204 = arith.subf %196, %203 : vector<8x32xf32>
    %205 = arith.mulf %204, %204 : vector<8x32xf32>
    %cst_78 = arith.constant dense<0.000000e+00> : vector<8xf32>
    %206 = vector.multi_reduction <add>, %205, %cst_78 [1] : vector<8x32xf32> to vector<8xf32>
    %207 = vector.shape_cast %206 : vector<8xf32> to vector<8x1xf32>
    %cst_79 = arith.constant 3.200000e+01 : f32
    %208 = vector.broadcast %cst_79 : f32 to vector<8x1xf32>
    %209 = arith.divf %207, %208 : vector<8x1xf32>
    %210 = vector.broadcast %202 : vector<8x1xf32> to vector<8x32xf32>
    %211 = arith.subf %196, %210 : vector<8x32xf32>
    %cst_80 = arith.constant 9.99999996E-13 : f32
    %212 = vector.broadcast %cst_80 : f32 to vector<8x1xf32>
    %213 = arith.addf %209, %212 : vector<8x1xf32>
    %214 = math.rsqrt %213 : vector<8x1xf32>
    %215 = vector.broadcast %214 : vector<8x1xf32> to vector<8x32xf32>
    %216 = arith.mulf %211, %215 : vector<8x32xf32>
    %217 = vector.broadcast %197 : vector<1x32xf32> to vector<8x32xf32>
    %218 = arith.mulf %216, %217 : vector<8x32xf32>
    %219 = vector.broadcast %198 : vector<1x32xf32> to vector<8x32xf32>
    %220 = arith.addf %218, %219 : vector<8x32xf32>
    %221 = arith.truncf %220 : vector<8x32xf32> to vector<8x32xbf16>
    %c0_81 = arith.constant 0 : index
    %c0_82 = arith.constant 0 : index
    %222 = vector.load %arg17[%c0_81, %c0_82] : memref<8x32xbf16, #tpu.memory_space<vmem>>, vector<8x32xbf16>
    tpu.vector_store %arg17[%c0_81, %c0_82], %221 {strides = array<i32>} : memref<8x32xbf16, #tpu.memory_space<vmem>>, vector<8x32xbf16>,
    return
  }
  func.func @transform_0(%arg0: i32) -> (i32, i32) {
    %c0_i32 = arith.constant 0 : i32
    %c0_i32_0 = arith.constant 0 : i32
    return %arg0, %c0_i32 : i32, i32
  }
  func.func @transform_1(%arg0: i32) -> (i32, i32, i32) {
    %c0_i32 = arith.constant 0 : i32
    %c0_i32_0 = arith.constant 0 : i32
    %c0_i32_1 = arith.constant 0 : i32
    return %arg0, %c0_i32, %c0_i32_0 : i32, i32, i32
  }
  func.func @transform_2(%arg0: i32) -> (i32, i32) {
    %c0_i32 = arith.constant 0 : i32
    %c0_i32_0 = arith.constant 0 : i32
    %c0_i32_1 = arith.constant 0 : i32
    return %c0_i32, %c0_i32_0 : i32, i32
  }
  func.func @transform_3(%arg0: i32) -> (i32, i32) {
    %c0_i32 = arith.constant 0 : i32
    %c0_i32_0 = arith.constant 0 : i32
    %c0_i32_1 = arith.constant 0 : i32
    return %c0_i32, %c0_i32_0 : i32, i32
  }
  func.func @transform_4(%arg0: i32) -> (i32, i32) {
    %c0_i32 = arith.constant 0 : i32
    %c0_i32_0 = arith.constant 0 : i32
    %c0_i32_1 = arith.constant 0 : i32
    return %c0_i32, %c0_i32_0 : i32, i32
  }
  func.func @transform_5(%arg0: i32) -> (i32, i32) {
    %c0_i32 = arith.constant 0 : i32
    %c0_i32_0 = arith.constant 0 : i32
    %c0_i32_1 = arith.constant 0 : i32
    return %c0_i32, %c0_i32_0 : i32, i32
  }
  func.func @transform_6(%arg0: i32) -> (i32, i32) {
    %c0_i32 = arith.constant 0 : i32
    %c0_i32_0 = arith.constant 0 : i32
    %c0_i32_1 = arith.constant 0 : i32
    return %c0_i32, %c0_i32_0 : i32, i32
  }
  func.func @transform_7(%arg0: i32) -> (i32, i32) {
    %c0_i32 = arith.constant 0 : i32
    %c0_i32_0 = arith.constant 0 : i32
    %c0_i32_1 = arith.constant 0 : i32
    return %c0_i32, %c0_i32_0 : i32, i32
  }
  func.func @transform_8(%arg0: i32) -> (i32, i32) {
    %c0_i32 = arith.constant 0 : i32
    %c0_i32_0 = arith.constant 0 : i32
    %c0_i32_1 = arith.constant 0 : i32
    return %c0_i32, %c0_i32_0 : i32, i32
  }
  func.func @transform_9(%arg0: i32) -> (i32, i32) {
    %c0_i32 = arith.constant 0 : i32
    %c0_i32_0 = arith.constant 0 : i32
    %c0_i32_1 = arith.constant 0 : i32
    return %c0_i32, %c0_i32_0 : i32, i32
  }
  func.func @transform_10(%arg0: i32) -> (i32, i32) {
    %c0_i32 = arith.constant 0 : i32
    %c0_i32_0 = arith.constant 0 : i32
    %c0_i32_1 = arith.constant 0 : i32
    return %c0_i32, %c0_i32_0 : i32, i32
  }
  func.func @transform_11(%arg0: i32) -> (i32, i32) {
    %c0_i32 = arith.constant 0 : i32
    %c0_i32_0 = arith.constant 0 : i32
    %c0_i32_1 = arith.constant 0 : i32
    return %c0_i32, %c0_i32_0 : i32, i32
  }
  func.func @transform_12(%arg0: i32) -> (i32, i32) {
    %c0_i32 = arith.constant 0 : i32
    %c0_i32_0 = arith.constant 0 : i32
    %c0_i32_1 = arith.constant 0 : i32
    return %c0_i32, %c0_i32_0 : i32, i32
  }
  func.func @transform_13(%arg0: i32) -> (i32, i32) {
    %c0_i32 = arith.constant 0 : i32
    %c0_i32_0 = arith.constant 0 : i32
    %c0_i32_1 = arith.constant 0 : i32
    return %c0_i32, %c0_i32_0 : i32, i32
  }
  func.func @transform_14(%arg0: i32) -> (i32, i32) {
    %c0_i32 = arith.constant 0 : i32
    %c0_i32_0 = arith.constant 0 : i32
    %c0_i32_1 = arith.constant 0 : i32
    return %c0_i32, %c0_i32_0 : i32, i32
  }
  func.func @transform_15(%arg0: i32) -> (i32, i32) {
    %c0_i32 = arith.constant 0 : i32
    %c0_i32_0 = arith.constant 0 : i32
    %c0_i32_1 = arith.constant 0 : i32
    return %c0_i32, %c0_i32_0 : i32, i32
  }
  func.func @transform_16(%arg0: i32) -> (i32, i32) {
    %c0_i32 = arith.constant 0 : i32
    %c0_i32_0 = arith.constant 0 : i32
    return %arg0, %c0_i32 : i32, i32
  }
}

</mosaic_0001>

<bundles_post_ra>
// kernel: tpu_custom_call.1
= control target key start
LH: loop header
LB: loop body
LE: loop exit
PB: predicated region body
PF: predicated region fallthrough
CT: control target
= control target key end

     0   :  { %s2703_s0 = inlined_call_operand.vmem [shape: f32[16,32], index: 0, kind: input, shape index: {}]   ;;  %s2704_s1 = inlined_call_operand.vmem [shape: f32[2,1,8], index: 1, kind: input, shape index: {}]   ;;  %s2705_s2 = inlined_call_operand.hbm [shape: f32[1,32], index: 2, kind: input, shape index: {}]   ;;  %s2706_s3 = inlined_call_operand.hbm [shape: f32[1,32], index: 3, kind: input, shape index: {}]   ;;  %s2707_s4 = inlined_call_operand.vmem [shape: bf16[32,96], index: 4, kind: input, shape index: {}]   ;;  %s2708_s5 = inlined_call_operand.hbm [shape: f32[1,96], index: 5, kind: input, shape index: {}]   ;;  %s2709_s6 = inlined_call_operand.vmem [shape: bf16[32,32], index: 6, kind: input, shape index: {}]   ;;  %s2710_s7 = inlined_call_operand.hbm [shape: f32[1,32], index: 7, kind: input, shape index: {}]   ;;  %s2711_s8 = inlined_call_operand.hbm [shape: f32[1,32], index: 8, kind: input, shape index: {}]   ;;  %s2712_s9 = inlined_call_operand.hbm [shape: f32[1,32], index: 9, kind: input, shape index: {}]   ;;  %s2713_s10 = inlined_call_operand.vmem [shape: bf16[32,64], index: 10, kind: input, shape index: {}]   ;;  %s2714_s11 = inlined_call_operand.vmem [shape: f32[1,64], index: 11, kind: input, shape index: {}]   ;;  %s2715_s12 = inlined_call_operand.vmem [shape: bf16[64,32], index: 12, kind: input, shape index: {}]   ;;  %s2716_s13 = inlined_call_operand.vmem [shape: f32[1,32], index: 13, kind: input, shape index: {}]   ;;  %s2717_s14 = inlined_call_operand.vmem [shape: f32[1,32], index: 14, kind: input, shape index: {}]   ;;  %s2718_s15 = inlined_call_operand.vmem [shape: f32[1,32], index: 15, kind: input, shape index: {}]   ;;  %s2719_s16 = inlined_call_operand.hbm [shape: bf16[16,32], index: 16, kind: output, shape index: {}]  }
   0x1   :  { %2732 = sst [smem:[#allocation26_spill]] %s2703_s0 }
   0x2   :  { %2733 = sst [smem:[#allocation27_spill]] %s2706_s3 }
   0x3   :  { %2734 = sst [smem:[#allocation28_spill]] %s2718_s15 }
   0x4   :  { %2735 = sst [smem:[#allocation29_spill]] %s2719_s16 }
   0x5   :  { %21 = vsyncpa [#allocation3], 0 }
   0x6   :  { %22 = vsyncpa [#allocation6], 0 }
   0x7   :  { %23 = vsyncpa [#allocation9], 0 }
   0x8   :  { %24 = vsyncpa [#allocation12], 0 }
   0x9   :  { %25 = vsyncpa [#allocation4], 0 }
   0xa   :  { %27 = vsyncpa [#allocation4 + $0x1], 0  ;;  %s2302_s21 = smov 0   ;;  %s2304_s22 = smov 0  }
   0xb   :  { %s2306_s23 = smov 0   ;;  %s2308_s24 = smov 0  }
   0xc LB: > { %2736 = sst [smem:[#allocation19_spill]] %s2180_s21  ;;  %s2323_s25 = sadd.s32 4294967295, %s2192_s24   ;;  %s2192_s24 = sphi %s2308_s24, %s2767_s24   ;;  %s2188_s23 = sphi %s2306_s23, %s2769_s23   ;;  %s2184_s22 = sphi %s2304_s22, %s2771_s22   ;;  %s2180_s21 = sphi %s2302_s21, %s2770_s21  }
   0xd   : > { %2737 = sst [smem:[#allocation20_spill]] %s2188_s23  ;;  %s1625_s26 = sadd.s32 4294967294, %s2192_s24  }
   0xe   : > { %2738 = sst [smem:[#allocation21_spill]] %s2192_s24  ;;  %s2327_s27 = sadd.s32 1, %s2192_s24  }
   0xf   : > { %2739 = sst [smem:[#allocation22_spill]] %s2327_s27  ;;  %s386_s28 = sadd.s32 1, %s2188_s23 }
  0x10   : > { %s383_s29 = ssub.s32 %s2192_s24, %s2327_s27  ;;  %p396_p0 = scmp.ne.s32.totalorder %s2188_s23, %s2184_s22 }
  0x11   : > { %p384_p1 = scmp.eq.s32.totalorder %s383_s29, 0  ;;  %p397_p2 = scmp.eq.s32.totalorder %s2323_s25, 1 }
  0x12   : > { %p402_p3 = scmp.ne.s32.totalorder %s2184_s22, %s2180_s21  ;;  %p403_p4 = scmp.eq.s32.totalorder %s1625_s26, 1 }
  0x13   : > { %s2338_s30 = scalar_select %p384_p1, %s2188_s23, %s386_s28  }
  0x14   : > { %p2340_p5 = por %p397_p2, %p396_p0  ;;  %p2344_p6 = por %p403_p4, %p402_p3 }
  0x15   : > { %2740 = sst [smem:[#allocation23_spill]] %s2338_s30  ;;  %p1626_p7 = scmp.ge.s32.totalorder %s2192_s24, 1 }
  0x16   : > { %s2741_s0 = scalar_select %p2340_p5, 1, 0 }
  0x17   : > { %s2743_s17 = scalar_select %p2344_p6, 1, 0 }
  0x18   : > { %2742 = sst [smem:[#allocation24_spill]] %s2741_s0  ;;  %p410_p8 = scmp.lt.s32.totalorder %s2192_s24, 3 }
  0x19   : > { %2744 = sst [smem:[#allocation25_spill]] %s2743_s17  ;;  %p2727_p9 = scmp.eq.s32.totalorder %s2323_s25, 0 }
  0x1a   : > { %p2351_p10 = pnand %p1626_p7, %p410_p8  ;;  %s2194_s19 = smov [#allocation5]  }
  0x1b   : > { %s434_s20 = sshll.u32 %s2194_s19, 4  ;;  %s2195_s26 = smov [#allocation8]   ;;  %s435_s20 = int_to_ptr.vmem [resolvable:$true] %s434_s20 }
  0x1c   : > { %s2745_s18 = scalar_select %p2351_p10, 1, 0 }
  0x1d   : > { %p1820_p11 = pneg %p2351_p10  ;;  %s462_s28 = sshll.u32 %s2195_s26, 4  ;;  %s2363_s28 = int_to_ptr.vmem [resolvable:$true] %s462_s28 }
  0x1e   : > { %s2196_s30 = smov [#allocation2]   ;;  %s2747_s3 = sld [smem:[#allocation27_spill]] }
  0x1f   : > { %p2359_p12 = pnand %p2727_p9, %p1820_p11  ;;  %s423_s23 = sshll.u32 %s2196_s30, 4  ;;  %s2365_s23 = int_to_ptr.vmem [resolvable:$true] %s423_s23 }
  0x21   : > { %p2375_p0 = pneg %p2359_p12 }
  0x24   : > { %s1946_s19 = scalar_lea.hbm %s2747_s3, 16 }
  0x25   : > { %p1947_p13 = scmp.ne.s32.totalorder %s2747_s3, %s1946_s19  ;;  %p1953_p3 = scmp.lt.u32.totalorder %s1946_s19, %s2747_s3 }
  0x27   : > { %p1949_p1 = pnand %p2375_p0, %p1947_p13 }
  0x29   : > { %p1950_p2 = pneg %p1949_p1 }
  0x2b   : > { %p1955_p4 = pnand %p1953_p3, %p1950_p2 }
  0x2d   : > { %1958 = shalt.err (!%p1955_p4)
}
  0x2e   : > { %s1959_s27 = scalar_lea.vmem %s435_s20, 16  ;;  %s1966_s21 = scalar_lea.vmem %s435_s20, 32 }
  0x2f   : > { %p1960_p7 = scmp.ne.s32.totalorder %s435_s20, %s1959_s27  ;;  %p1967_p9 = scmp.lt.s32.totalorder %s435_s20, %s435_s20 }
  0x30   : > { %p1968_p6 = scmp.lt.s32.totalorder %s1966_s21, %s1959_s27 }
  0x31   : > { %p1962_p8 = pnand %p1960_p7, %p2375_p0 }
  0x32   : > { %p1969_p5 = por %p1968_p6, %p1967_p9 }
  0x33   : > { %p1963_p11 = pneg %p1962_p8 }
  0x35   : > { %p1970_p10 = pnand %p1969_p5, %p1963_p11 }
  0x37   : > { %1973 = shalt.err (!%p1970_p10)
}
  0x38   : > { %1826 = dma.hbm_to_vmem [thread:$0]  (!%p2359_p12), %s2747_s3, 16, %s435_s20, [#allocation6]  }
  0x39   : > { %s1974_s30 = scalar_lea.hbm %s2710_s7, 16 }
  0x3a   : > { %p1975_p13 = scmp.ne.s32.totalorder %s2710_s7, %s1974_s30  ;;  %p1981_p5 = scmp.lt.u32.totalorder %s1974_s30, %s2710_s7 }
  0x3c   : > { %p1977_p1 = pnand %p1975_p13, %p2375_p0 }
  0x3e   : > { %p1978_p6 = pneg %p1977_p1 }
  0x40   : > { %p1983_p9 = pnand %p1981_p5, %p1978_p6 }
  0x42   : > { %1986 = shalt.err (!%p1983_p9)
}
  0x43   : > { %s1987_s20 = scalar_lea.vmem %s2363_s28, 16  ;;  %s1994_s15 = scalar_lea.vmem %s2363_s28, 32 }
  0x44   : > { %p1988_p10 = scmp.ne.s32.totalorder %s2363_s28, %s1987_s20  ;;  %p1995_p4 = scmp.lt.s32.totalorder %s2363_s28, %s2363_s28 }
  0x45   : > { %p1996_p7 = scmp.lt.s32.totalorder %s1994_s15, %s1987_s20 }
  0x46   : > { %p1990_p2 = pnand %p1988_p10, %p2375_p0 }
  0x47   : > { %p1997_p8 = por %p1996_p7, %p1995_p4 }
  0x48   : > { %p1991_p3 = pneg %p1990_p2 }
  0x4a   : > { %p1998_p11 = pnand %p1997_p8, %p1991_p3 }
  0x4c   : > { %2001 = shalt.err (!%p1998_p11)
}
  0x4d   : > { %1832 = dma.hbm_to_vmem [thread:$0]  (!%p2359_p12), %s2710_s7, 16, %s2363_s28, [#allocation9]  }
  0x4e   : > { %s2002_s19 = scalar_lea.hbm %s2705_s2, 16 }
  0x4f   : > { %p2003_p13 = scmp.ne.s32.totalorder %s2705_s2, %s2002_s19  ;;  %p2009_p5 = scmp.lt.u32.totalorder %s2002_s19, %s2705_s2 }
  0x51   : > { %p2005_p1 = pnand %p2003_p13, %p2375_p0 }
  0x53   : > { %p2006_p6 = pneg %p2005_p1 }
  0x55   : > { %p2011_p9 = pnand %p2009_p5, %p2006_p6 }
  0x57   : > { %2014 = shalt.err (!%p2011_p9)
}
  0x58   : > { %s2015_s28 = scalar_lea.vmem %s2365_s23, 16  ;;  %s2022_s15 = scalar_lea.vmem %s2365_s23, 32 }
  0x59   : > { %p2016_p10 = scmp.ne.s32.totalorder %s2365_s23, %s2015_s28  ;;  %p2023_p4 = scmp.lt.s32.totalorder %s2365_s23, %s2365_s23 }
  0x5a   : > { %p2024_p7 = scmp.lt.s32.totalorder %s2022_s15, %s2015_s28 }
  0x5b   : > { %p2018_p2 = pnand %p2016_p10, %p2375_p0 }
  0x5c   : > { %p2025_p8 = por %p2024_p7, %p2023_p4 }
  0x5d   : > { %p2019_p3 = pneg %p2018_p2 }
  0x5f   : > { %p2026_p11 = pnand %p2025_p8, %p2019_p3 }
  0x61   : > { %2029 = shalt.err (!%p2026_p11)
}
  0x62   : > { %1823 = dma.hbm_to_vmem [thread:$0]  (!%p2359_p12), %s2705_s2, 16, %s2365_s23, [#allocation3]  }
  0x63   : > { %s2197_s17 = smov [#allocation7]   ;;  %s2198_s19 = smov [#allocation10]  }
  0x64   : > { %s448_s16 = sshll.u32 %s2197_s17, 4  ;;  %s473_s30 = sshll.u32 %s2198_s19, 4  ;;  %s449_s16 = int_to_ptr.vmem [resolvable:$true] %s448_s16  ;;  %s474_s30 = int_to_ptr.vmem [resolvable:$true] %s473_s30 }
  0x65   : > { %s2030_s20 = scalar_lea.hbm %s2708_s5, 16 }
  0x66   : > { %p2031_p13 = scmp.ne.s32.totalorder %s2708_s5, %s2030_s20  ;;  %p2037_p5 = scmp.lt.u32.totalorder %s2030_s20, %s2708_s5 }
  0x68   : > { %p2033_p1 = pnand %p2031_p13, %p2375_p0 }
  0x6a   : > { %p2034_p6 = pneg %p2033_p1 }
  0x6c   : > { %p2039_p9 = pnand %p2037_p5, %p2034_p6 }
  0x6e   : > { %2042 = shalt.err (!%p2039_p9)
}
  0x6f   : > { %s2043_s23 = scalar_lea.vmem %s449_s16, 16  ;;  %s2050_s24 = scalar_lea.vmem %s449_s16, 32 }
  0x70   : > { %p2044_p10 = scmp.ne.s32.totalorder %s449_s16, %s2043_s23  ;;  %p2051_p4 = scmp.lt.s32.totalorder %s449_s16, %s449_s16 }
  0x71   : > { %p2052_p7 = scmp.lt.s32.totalorder %s2050_s24, %s2043_s23 }
  0x72   : > { %p2046_p2 = pnand %p2044_p10, %p2375_p0 }
  0x73   : > { %p2053_p8 = por %p2052_p7, %p2051_p4 }
  0x74   : > { %p2047_p3 = pneg %p2046_p2 }
  0x76   : > { %p2054_p11 = pnand %p2053_p8, %p2047_p3 }
  0x78   : > { %2057 = shalt.err (!%p2054_p11)
}
  0x79   : > { %1829 = dma.hbm_to_vmem [thread:$0]  (!%p2359_p12), %s2708_s5, 16, %s449_s16, [#allocation6]  }
  0x7a   : > { %s2058_s21 = scalar_lea.hbm %s2711_s8, 16 }
  0x7b   : > { %p2059_p13 = scmp.ne.s32.totalorder %s2711_s8, %s2058_s21  ;;  %p2065_p5 = scmp.lt.u32.totalorder %s2058_s21, %s2711_s8 }
  0x7d   : > { %p2061_p1 = pnand %p2059_p13, %p2375_p0 }
  0x7f   : > { %p2062_p6 = pneg %p2061_p1 }
  0x81   : > { %p2067_p9 = pnand %p2065_p5, %p2062_p6 }
  0x83   : > { %2070 = shalt.err (!%p2067_p9)
}
  0x84   : > { %s2071_s23 = scalar_lea.vmem %s474_s30, 16  ;;  %s2078_s16 = scalar_lea.vmem %s474_s30, 32 }
  0x85   : > { %p2072_p10 = scmp.ne.s32.totalorder %s474_s30, %s2071_s23  ;;  %p2079_p4 = scmp.lt.s32.totalorder %s474_s30, %s474_s30 }
  0x86   : > { %p2080_p7 = scmp.lt.s32.totalorder %s2078_s16, %s2071_s23 }
  0x87   : > { %p2074_p2 = pnand %p2072_p10, %p2375_p0 }
  0x88   : > { %p2081_p8 = por %p2080_p7, %p2079_p4 }
  0x89   : > { %p2075_p3 = pneg %p2074_p2 }
  0x8b   : > { %p2082_p11 = pnand %p2081_p8, %p2075_p3 }
  0x8d   : > { %2085 = shalt.err (!%p2082_p11)
}
  0x8e   : > { %1835 = dma.hbm_to_vmem [thread:$0]  (!%p2359_p12), %s2711_s8, 16, %s474_s30, [#allocation9]  }
  0x8f   : > { %s2199_s19 = smov [#allocation11]   ;;  %s2086_s20 = scalar_lea.hbm %s2712_s9, 16 }
  0x90   : > { %s484_s3 = sshll.u32 %s2199_s19, 4  ;;  %p2087_p13 = scmp.ne.s32.totalorder %s2712_s9, %s2086_s20  ;;  %s485_s3 = int_to_ptr.vmem [resolvable:$true] %s484_s3 }
  0x91   : > { %p2093_p5 = scmp.lt.u32.totalorder %s2086_s20, %s2712_s9 }
  0x92   : > { %p2089_p1 = pnand %p2087_p13, %p2375_p0 }
  0x94   : > { %p2090_p6 = pneg %p2089_p1 }
  0x96   : > { %p2095_p9 = pnand %p2093_p5, %p2090_p6 }
  0x98   : > { %2098 = shalt.err (!%p2095_p9)
}
  0x99   : > { %s2099_s30 = scalar_lea.vmem %s485_s3, 16  ;;  %s2106_s16 = scalar_lea.vmem %s485_s3, 32 }
  0x9a   : > { %p2100_p10 = scmp.ne.s32.totalorder %s485_s3, %s2099_s30  ;;  %p2107_p4 = scmp.lt.s32.totalorder %s485_s3, %s485_s3 }
  0x9b   : > { %p2108_p7 = scmp.lt.s32.totalorder %s2106_s16, %s2099_s30 }
  0x9c   : > { %p2102_p2 = pnand %p2100_p10, %p2375_p0 }
  0x9d   : > { %p2109_p8 = por %p2108_p7, %p2107_p4 }
  0x9e   : > { %p2103_p3 = pneg %p2102_p2 }
  0xa0   : > { %p2110_p11 = pnand %p2109_p8, %p2103_p3 }
  0xa2   : > { %2113 = shalt.err (!%p2110_p11)
}
  0xa3   : > { %1838 = dma.hbm_to_vmem [thread:$0]  (!%p2359_p12), %s2712_s9, 16, %s485_s3, [#allocation12]  }
  0xa4   : > { %p2749_p13 = scmp.ne.s32.totalorder %s2745_s18, 0 }
  0xa5   : > { %p2750_p1 = scmp.eq.s32.totalorder (!%p2749_p13), %s2323_s25, 0 }
  0xa6   : > { %528 = sbr.rel (%p2749_p13) target bundleno = 3107 (0xc23), region = 84 }
  0xad   : > { %2159 = dma.done.wait (%p2750_p1), [#allocation3], 16   ;;  %p2751_p0 = pmov %p2750_p1 }
  0xaf   : > { %2161 = vsyncadd (%p2751_p0), [#allocation3], 4294967280  ;;  %p2752_p6 = pmov %p2751_p0 }
  0xb0   : > { %p2753_p5 = pmov %p2751_p0 }
  0xb1   : > { %2163 = dma.done.wait (%p2752_p6), [#allocation6], 32  }
  0xb2   : > { %2165 = vsyncadd (%p2753_p5), [#allocation6], 4294967264  ;;  %p2754_p9 = pmov %p2751_p0 }
  0xb3   : > { %p2755_p12 = pmov %p2751_p0 }
  0xb4   : > { %2167 = dma.done.wait (%p2754_p9), [#allocation9], 32  }
  0xb5   : > { %2169 = vsyncadd (%p2755_p12), [#allocation9], 4294967264  ;;  %p2756_p10 = pmov %p2751_p0 }
  0xb6   : > { %p2757_p2 = pmov %p2751_p0 }
  0xb7   : > { %2171 = dma.done.wait (%p2756_p10), [#allocation12], 16  }
  0xb8   : > { %2173 = vsyncadd (%p2757_p2), [#allocation12], 4294967280  ;;  %p600_p3 = scmp.lt.s32.totalorder %s2323_s25, 1  ;;  %s2758_s3 = sld [smem:[#allocation26_spill]]  ;;  %vm611_vm0 = vcmask 261120   ;;  %v1910_v7 = vld [vmem:[%s2707_s4] sm:$0xff]  }
  0xb9   : > { %v2200_v8 = vmov 0.0   ;;  %v1911_v9 = vld [vmem:[%s2707_s4 + $0x8] sm:$0xff]   ;;  %vm2201_vm1 = vmmov 0   ;;  %v1643_v14 = vld [vmem:[#allocation2] ss:$0 sm:$0xff]  ;;  %s2202_s0 = smov 96  }
  0xba   : > { %s2513_s18 = scalar_select %p600_p3, %s2323_s25, 1  ;;  %1710 = vmatprep.subr.bf16.mxu0 %v2200_v8  ;;  %1718 = vmatprep.subr.bf16.mxu1 %v2200_v8  ;;  %v1644_v16 = vld [vmem:[#allocation5] ss:$0 sm:$0xff]  ;;  %v1645_v20 = vld [vmem:[#allocation7] ss:$0 sm:$0xff]  ;;  %vm720_vm2 = vcmask 64512  }
  0xbb   : > { %1711 = vmatpush3.bf16.msra.mxu0 %v1910_v7  ;;  %1714 = vmatprep.mubr.msk.bf16.mxu0 %vm2201_vm1, %v2200_v8  ;;  %s2203_s23 = smov 120   ;;  %s2204_s30 = smov 88   ;;  %vm784_vm3 = vcmask 1043456   ;;  %vm1172_vm4 = vcmask 130048   ;;  %vm1174_vm5 = vcmask 195584   ;;  %vm1406_vm7 = vcmask 523264  }
  0xbc   : > { %s1642_s29 = sshll.u32 %s2513_s18, 3  ;;  %1712 = vmatprep.subr.bf16.mxu0 %v2200_v8  ;;  %1720 = vmatprep.mubr.msk.bf16.mxu1 %vm2201_vm1, %v2200_v8  ;;  %s2205_s16 = smov 80   ;;  %vm1481_vm8 = vcmask 257024  }
  0xbd   : > { %s2206_s24 = smov 112   ;;  %s2207_s17 = smov 72  }
  0xbe   : > { %s603_s27 = scalar_lea.vmem %s2758_s3, %s1642_s29  ;;  %s2208_s29 = smov 104  }
  0xbf   : > { %v608_v0 = vld [vmem:[%s603_s27] sm:$0xff]  ;;  %1713 = vmatpush3.bf16.msra.mxu0 %v1911_v9  ;;  %s606_s3 = scalar_lea.vmem %s2704_s1, %s2513_s18  ;;  %s2209_s18 = smov 64  }
  0xc0   : > { %v612_v1 = vsel %vm611_vm0, %v608_v0, 0.0  ;;  %1724 = vmatprep.subr.bf16.mxu0 %v2200_v8  ;;  %v1649_v40 = vld [vmem:[%s606_s3] ss:$0 sm:$0xff]  ;;  %s2210_s27 = smov 56   ;;  %s2211_s21 = smov 48  }
  0xc1   : > { %613 = vadd.xlane.f32.xlu0 %v612_v1  ;;  %s2212_s20 = smov 40   ;;  %s2213_s28 = smov 8  }
  0xc2   : > { %s2759_s3 = sld [smem:[#allocation24_spill]] }
  0xc8   : > { %p2762_p7 = scmp.ne.s32.totalorder %s2759_s3, 0 }
 0x14e   : > { %v614_v2 = vpop.xlane.xlu0 %613 }
 0x14f   : > { %v616_v3 = vmul.f32 0.03125, %v614_v2 }
 0x151   : > { %v617_v4 = vsub.f32 %v608_v0, %v616_v3 }
 0x153   : > { %v618_v5 = vmul.f32 %v617_v4, %v617_v4 }
 0x155   : > { %v619_v6 = vsel %vm611_vm0, %v618_v5, 0.0 }
 0x156   : > { %620 = vadd.xlane.f32.xlu0 %v619_v6 }
 0x1e3   : > { %v621_v10 = vpop.xlane.xlu0 %620 }
 0x1e4   : > { %v622_v11 = vmul.f32 0.03125, %v621_v10 }
 0x1e6   : > { %v623_v12 = vadd.f32 1e-12, %v622_v11 }
 0x1e8   : > { %1920 = vrsqrt.f32 %v623_v12 }
 0x1f2   : > { %v1921_v13 = vpop.eup %1920 }
 0x1f3   : > { %v625_v15 = vmul.f32 %v1921_v13, %v617_v4 }
 0x1f5   : > { %v632_v17 = vmul.f32 %v1643_v14, %v625_v15 }
 0x1f7   : > { %v2535_v18 = vadd.f32 %v1644_v16, %v632_v17 }
 0x1f9   : > { %v640_v19 = vpack.c.bf16 %v2535_v18, %v2535_v18 }
 0x1fb   : > { %1715 = vmatmul.mubr.msk.bf16.vlgmr.msra.gmra.mrb[0].mxu0 %vm611_vm0, %v640_v19 }
 0x1fc   : > { %1726 = vmatprep.mubr.msk.bf16.mxu0 %vm2201_vm1, %v2200_v8 }
 0x2ce   : > { %v701_v21 = vpop.f32.mrb[0].mxu0 }
 0x2cf   : > { %v702_v22 = vadd.f32 %v1645_v20, %v701_v21  ;;  %v1716_v23 = vpop.f32.mrb[1].mxu0 }
 0x2d0   : > { %v704_v24 = vpop.f32.mrb[2].mxu0 }
 0x2d1   : > { %v708_v25 = vmul.f32 0.35355338, %v702_v22  ;;  %v2542_v26 = vpack.c.bf16 %v702_v22, %v702_v22  ;;  %v1717_v27 = vpop.f32.mrb[3].mxu0 }
 0x2d3   : > { %v709_v28 = vpack.c.bf16 %v708_v25, %v708_v25  ;;  %718 = vrot.lane.b32.xlu1 %v2542_v26, %s2202_s0 }
 0x2d5   : > { %829 = vrot.lane.b32.xlu0 %v709_v28, %s2203_s23 }
 0x2d7   : > { %831 = vrot.lane.b32.xlu1 %v2542_v26, %s2204_s30  ;;  %s2761_s30 = sld [smem:[#allocation29_spill]] }
 0x2db   : > { %941 = vrot.lane.b32.xlu1 %v2542_v26, %s2205_s16  ;;  %s2214_s16 = smov 16  }
 0x2df   : > { %939 = vrot.lane.b32.xlu1 %v709_v28, %s2206_s24  ;;  %s2215_s24 = smov 24  }
 0x2e3   : > { %1051 = vrot.lane.b32.xlu1 %v2542_v26, %s2207_s17  ;;  %s597_s17 = sand.u32 1, %s2184_s22  }
 0x2e7   : > { %1049 = vrot.lane.b32.xlu1 %v709_v28, %s2208_s29  ;;  %s1641_s29 = sshll.u32 %s597_s17, 2 }
 0x345   : > { %v719_v29 = vpop.permute.xlu1 %718 }
 0x346   : > { %v725_v30 = vsel %vm720_vm2, %v719_v29, 0 }
 0x347   : > { %1719 = vmatpush3.bf16.xpose.msra.mxu1 %v725_v30  ;;  %v830_v34 = vpop.permute.xlu0 %829 }
 0x348   : > { %1730 = vmatprep.subr.bf16.mxu1 %v2200_v8 }
 0x349   : > { %v832_v31 = vpop.permute.xlu1 %831 }
 0x34a   : > { %v837_v32 = vsel %vm720_vm2, %v832_v31, 0 }
 0x34d   : > { %v942_v33 = vpop.permute.xlu1 %941 }
 0x34e   : > { %1721 = vmatmul.mubr.msk.bf16.vlgmr.msra.gmra.mrb[0].mxu1 %vm720_vm2, %v709_v28  ;;  %v947_v36 = vsel %vm720_vm2, %v942_v33, 0 }
 0x34f   : > { %1731 = vmatpush3.bf16.xpose.msra.mxu1 %v837_v32  ;;  %1732 = vmatprep.mubr.msk.bf16.mxu1 %vm2201_vm1, %v2200_v8 }
 0x350   : > { %1742 = vmatprep.subr.bf16.mxu1 %v2200_v8 }
 0x351   : > { %v940_v35 = vpop.permute.xlu1 %939 }
 0x355   : > { %v1052_v37 = vpop.permute.xlu1 %1051 }
 0x356   : > { %1733 = vmatmul.mubr.msk.bf16.vlgmr.msra.gmra.mrb[4].mxu1 %vm720_vm2, %v830_v34  ;;  %v1057_v38 = vsel %vm720_vm2, %v1052_v37, 0 }
 0x357   : > { %1743 = vmatpush3.bf16.xpose.msra.mxu1 %v947_v36  ;;  %1744 = vmatprep.mubr.msk.bf16.mxu1 %vm2201_vm1, %v2200_v8 }
 0x358   : > { %1754 = vmatprep.subr.bf16.mxu1 %v2200_v8 }
 0x359   : > { %v1050_v39 = vpop.permute.xlu1 %1049 }
 0x35e   : > { %1745 = vmatmul.mubr.msk.bf16.vlgmr.msra.gmra.mrb[8].mxu1 %vm720_vm2, %v940_v35 }
 0x35f   : > { %1755 = vmatpush3.bf16.xpose.msra.mxu1 %v1057_v38  ;;  %1756 = vmatprep.mubr.msk.bf16.mxu1 %vm2201_vm1, %v2200_v8 }
 0x360   : > { %1766 = vmatprep.subr.bf16.mxu1 %v2200_v8 }
 0x366   : > { %1757 = vmatmul.mubr.msk.bf16.vlgmr.msra.gmra.mrb[12].mxu1 %vm720_vm2, %v1050_v39 }
 0x367   : > { %1770 = vmatprep.mubr.msk.bf16.mxu1 %vm2201_vm1, %v2200_v8 }
 0x421   : > { %v761_v41 = vpop.f32.mrb[0].mxu1 }
 0x422   : > { %v762_v42 = vadd.f32 %v1649_v40, %v761_v41  ;;  %v1722_v43 = vpop.f32.mrb[1].mxu1 }
 0x423   : > { %v764_v44 = vpop.f32.mrb[2].mxu1 }
 0x424   : > { %v1723_v45 = vpop.f32.mrb[3].mxu1  ;;  %v767_v46 = vsel %vm720_vm2, %v762_v42, -inf }
 0x425   : > { %768 = vmax.xlane.f32.xlu1 %v767_v46 }
 0x429   : > { %v873_v47 = vpop.f32.mrb[4].mxu1 }
 0x42a   : > { %v874_v48 = vadd.f32 %v1649_v40, %v873_v47  ;;  %v1734_v49 = vpop.f32.mrb[5].mxu1 }
 0x42b   : > { %v876_v50 = vpop.f32.mrb[6].mxu1 }
 0x42c   : > { %v1735_v51 = vpop.f32.mrb[7].mxu1  ;;  %v879_v52 = vsel %vm720_vm2, %v874_v48, -inf }
 0x42d   : > { %880 = vmax.xlane.f32.xlu0 %v879_v52 }
 0x431   : > { %v983_v53 = vpop.f32.mrb[8].mxu1 }
 0x432   : > { %v984_v54 = vadd.f32 %v1649_v40, %v983_v53  ;;  %v1746_v55 = vpop.f32.mrb[9].mxu1 }
 0x433   : > { %v986_v56 = vpop.f32.mrb[10].mxu1  ;;  %v1912_v55 = vld [vmem:[%s2709_s6] sm:$0xff]  }
 0x434   : > { %v1747_v57 = vpop.f32.mrb[11].mxu1  ;;  %v989_v58 = vsel %vm720_vm2, %v984_v54, -inf  ;;  %1767 = vmatpush3.bf16.msra.mxu1 %v1912_v55  ;;  %v1913_v56 = vld [vmem:[%s2709_s6 + $0x8] sm:$0xff]  }
 0x435   : > { %990 = vmax.xlane.f32.xlu1 %v989_v58  ;;  %1768 = vmatprep.subr.bf16.mxu1 %v2200_v8 }
 0x438   : > { %1769 = vmatpush3.bf16.msra.mxu1 %v1913_v56 }
 0x439   : > { %v1093_v59 = vpop.f32.mrb[12].mxu1  ;;  %1782 = vmatprep.subr.bf16.mxu1 %v2200_v8 }
 0x43a   : > { %v1094_v60 = vadd.f32 %v1649_v40, %v1093_v59  ;;  %v1758_v61 = vpop.f32.mrb[13].mxu1 }
 0x43b   : > { %v1096_v62 = vpop.f32.mrb[14].mxu1 }
 0x43c   : > { %v1759_v63 = vpop.f32.mrb[15].mxu1  ;;  %v1099_v0 = vsel %vm720_vm2, %v1094_v60, -inf }
 0x43d   : > { %1100 = vmax.xlane.f32.xlu0 %v1099_v0 }
 0x4b2   : > { %v769_v1 = vpop.xlane.xlu1 %768 }
 0x4b3   : > { %v770_v2 = vsub.f32 %v762_v42, %v769_v1 }
 0x4b5   : > { %v771_v3 = vmul.f32 1.442695, %v770_v2 }
 0x4b7   : > { %1922 = vpow2.f32 %v771_v3 }
 0x4ba   : > { %v881_v4 = vpop.xlane.xlu0 %880 }
 0x4bb   : > { %v882_v5 = vsub.f32 %v874_v48, %v881_v4 }
 0x4bd   : > { %v883_v6 = vmul.f32 1.442695, %v882_v5 }
 0x4bf   : > { %1924 = vpow2.f32 %v883_v6 }
 0x4c1   : > { %v1923_v7 = vpop.eup %1922 }
 0x4c2   : > { %v773_v9 = vsel %vm720_vm2, %v1923_v7, 0.0  ;;  %v991_v17 = vpop.xlane.xlu1 %990 }
 0x4c3   : > { %774 = vadd.xlane.f32.xlu1 %v773_v9  ;;  %v992_v19 = vsub.f32 %v984_v54, %v991_v17  ;;  %v1658_v9 = vld [vmem:[#allocation8] ss:$0 sm:$0xff] }
 0x4c5   : > { %v993_v20 = vmul.f32 1.442695, %v992_v19 }
 0x4c9   : > { %v1925_v10 = vpop.eup %1924 }
 0x4ca   : > { %v1101_v11 = vpop.xlane.xlu0 %1100  ;;  %v885_v12 = vsel %vm720_vm2, %v1925_v10, 0.0 }
 0x4cb   : > { %v1102_v13 = vsub.f32 %v1094_v60, %v1101_v11  ;;  %886 = vadd.xlane.f32.xlu0 %v885_v12 }
 0x4cd   : > { %v1103_v14 = vmul.f32 1.442695, %v1102_v13 }
 0x4cf   : > { %1926 = vpow2.f32 %v1103_v14 }
 0x4d0   : > { %1928 = vpow2.f32 %v993_v20 }
 0x4d4   : > { %779 = vrot.lane.b32.xlu1 %v2542_v26, %s2209_s18 }
 0x4d9   : > { %v1927_v15 = vpop.eup %1926 }
 0x4da   : > { %v1105_v16 = vsel %vm720_vm2, %v1927_v15, 0.0  ;;  %v1929_v21 = vpop.eup %1928 }
 0x4db   : > { %1106 = vadd.xlane.f32.xlu0 %v1105_v16  ;;  %v995_v22 = vsel %vm720_vm2, %v1929_v21, 0.0 }
 0x4f1   : > { %891 = vrot.lane.b32.xlu0 %v2542_v26, %s2210_s27 }
 0x4f8   : > { %996 = vadd.xlane.f32.xlu1 %v995_v22 }
 0x509   : > { %1001 = vrot.lane.b32.xlu1 %v2542_v26, %s2211_s21  ;;  %s2760_s21 = sld [smem:[#allocation28_spill]] }
 0x50d   : > { %1111 = vrot.lane.b32.xlu1 %v2542_v26, %s2212_s20  ;;  %s1677_s20 = sshll.u32 %s2323_s25, 6  ;;  %s2216_s25 = smov [#allocation13]  }
 0x550   : > { %v775_v23 = vpop.xlane.xlu1 %774 }
 0x551   : > { %1930 = vrcp.f32 %v775_v23  ;;  %v1914_v23 = vld [vmem:[%s2713_s10] sm:$0xff]  }
 0x554   : > { %v780_v24 = vpop.permute.xlu1 %779 }
 0x555   : > { %v786_v25 = vsel %vm784_vm3, %v780_v24, 0  ;;  %v1915_v24 = vld [vmem:[%s2713_s10 + $0x8] sm:$0xff]  }
 0x556   : > { %1725 = vmatpush3.bf16.msra.mxu0 %v786_v25 }
 0x557   : > { %1736 = vmatprep.subr.bf16.mxu0 %v2200_v8 }
 0x558   : > { %v887_v28 = vpop.xlane.xlu0 %886 }
 0x559   : > { %1932 = vrcp.f32 %v887_v28 }
 0x55b   : > { %v1931_v27 = vpop.eup %1930 }
 0x55c   : > { %v777_v29 = vmul.f32 %v1931_v27, %v1923_v7 }
 0x55e   : > { %v778_v30 = vpack.c.bf16 %v777_v29, %v777_v29  ;;  %v1662_v29 = vld [vmem:[#allocation10] ss:$0 sm:$0xff] }
 0x560   : > { %1727 = vmatmul.mubr.msk.bf16.vlgmr.msra.gmra.mrb[4].mxu0 %vm720_vm2, %v778_v30 }
 0x561   : > { %1738 = vmatprep.mubr.msk.bf16.mxu0 %vm2201_vm1, %v2200_v8 }
 0x563   : > { %v1933_v26 = vpop.eup %1932 }
 0x564   : > { %v889_v32 = vmul.f32 %v1933_v26, %v1925_v10  ;;  %v1663_v26 = vld [vmem:[#allocation11] ss:$0 sm:$0xff] }
 0x566   : > { %v890_v35 = vpack.c.bf16 %v889_v32, %v889_v32 }
 0x568   : > { %v1107_v31 = vpop.xlane.xlu0 %1106 }
 0x56c   : > { %v892_v33 = vpop.permute.xlu0 %891 }
 0x56d   : > { %v897_v34 = vsel %vm784_vm3, %v892_v33, 0 }
 0x56e   : > { %1737 = vmatpush3.bf16.msra.mxu0 %v897_v34  ;;  %v1916_v34 = vld [vmem:[%s2715_s12] sm:$0xff]  }
 0x56f   : > { %1748 = vmatprep.subr.bf16.mxu0 %v2200_v8 }
 0x571   : > { %1739 = vmatmul.mubr.msk.bf16.vlgmr.msra.gmra.mrb[8].mxu0 %vm720_vm2, %v890_v35  ;;  %v1917_v35 = vld [vmem:[%s2715_s12 + $0x8] sm:$0xff]  }
 0x572   : > { %1750 = vmatprep.mubr.msk.bf16.mxu0 %vm2201_vm1, %v2200_v8 }
 0x585   : > { %v997_v36 = vpop.xlane.xlu1 %996 }
 0x586   : > { %1934 = vrcp.f32 %v997_v36  ;;  %v1918_v36 = vld [vmem:[%s2715_s12 + $0x10] sm:$0xff]  }
 0x587   : > { %1936 = vrcp.f32 %v1107_v31 }
 0x589   : > { %v1002_v37 = vpop.permute.xlu1 %1001 }
 0x58a   : > { %v1007_v38 = vsel %vm784_vm3, %v1002_v37, 0  ;;  %v1919_v37 = vld [vmem:[%s2715_s12 + $0x18] sm:$0xff]  }
 0x58b   : > { %1749 = vmatpush3.bf16.msra.mxu0 %v1007_v38  ;;  %v1664_v38 = vld [vmem:[%s2714_s11] ss:$0 sm:$0xff] }
 0x58c   : > { %1760 = vmatprep.subr.bf16.mxu0 %v2200_v8 }
 0x58d   : > { %v1112_v41 = vpop.permute.xlu1 %1111 }
 0x58e   : > { %v1117_v44 = vsel %vm784_vm3, %v1112_v41, 0 }
 0x590   : > { %v1935_v39 = vpop.eup %1934 }
 0x591   : > { %v999_v40 = vmul.f32 %v1935_v39, %v1929_v21  ;;  %v1937_v43 = vpop.eup %1936 }
 0x592   : > { %v1109_v45 = vmul.f32 %v1937_v43, %v1927_v15 }
 0x593   : > { %v1000_v42 = vpack.c.bf16 %v999_v40, %v999_v40 }
 0x594   : > { %v1110_v46 = vpack.c.bf16 %v1109_v45, %v1109_v45 }
 0x595   : > { %1751 = vmatmul.mubr.msk.bf16.vlgmr.msra.gmra.mrb[12].mxu0 %vm720_vm2, %v1000_v42 }
 0x596   : > { %1761 = vmatpush3.bf16.msra.mxu0 %v1117_v44  ;;  %1762 = vmatprep.mubr.msk.bf16.mxu0 %vm2201_vm1, %v2200_v8 }
 0x597   : > { %1774 = vmatprep.subr.bf16.mxu0 %v2200_v8 }
 0x59d   : > { %1763 = vmatmul.mubr.msk.bf16.vlgmr.msra.gmra.mrb[16].mxu0 %vm720_vm2, %v1110_v46 }
 0x59e   : > { %1778 = vmatprep.mubr.msk.bf16.mxu0 %vm2201_vm1, %v2200_v8  ;;  %1775 = vmatpush3.bf16.msra.mxu0 %v1914_v23 }
 0x59f   : > { %1776 = vmatprep.subr.bf16.mxu0 %v2200_v8 }
 0x5a2   : > { %1777 = vmatpush3.bf16.msra.mxu0 %v1915_v24  ;;  %v1674_v24 = vld [vmem:[%s2717_s14] ss:$0 sm:$0xff] }
 0x633   : > { %v822_v47 = vpop.f32.mrb[4].mxu0 }
 0x634   : > { %v1728_v48 = vpop.f32.mrb[5].mxu0 }
 0x635   : > { %v825_v49 = vpop.f32.mrb[6].mxu0 }
 0x636   : > { %v1729_v50 = vpop.f32.mrb[7].mxu0 }
 0x644   : > { %v933_v51 = vpop.f32.mrb[8].mxu0 }
 0x645   : > { %1160 = vrot.lane.b32.xlu0 %v933_v51, %s2213_s28  ;;  %v1740_v52 = vpop.f32.mrb[9].mxu0  ;;  %s599_s28 = scalar_lea.vmem [#allocation13], %s1641_s29  ;;  %s2118_s29 = sshll.u32 %s2216_s25, 4  ;;  %s2119_s29 = int_to_ptr.vmem [resolvable:$false] %s2118_s29 }
 0x646   : > { %v936_v53 = vpop.f32.mrb[10].mxu0  ;;  %s1497_s15 = sshll.u32 %s599_s28, 4  ;;  %s2120_s19 = scalar_lea.vmem %s2119_s29, 128  ;;  %s2663_s15 = int_to_ptr.vmem [resolvable:$true] %s1497_s15 }
 0x647   : > { %v1741_v54 = vpop.f32.mrb[11].mxu0  ;;  %s2114_s26 = scalar_lea.vmem %s2663_s15, 64  ;;  %p2121_p13 = scmp.lt.s32.totalorder %s2663_s15, %s2119_s29 }
 0x648   : > { %p2115_p4 = scmp.ne.s32.totalorder %s2663_s15, %s2114_s26  ;;  %p2122_p1 = scmp.lt.s32.totalorder %s2120_s19, %s2114_s26 }
 0x64a   : > { %p2116_p8 = pnand %p2115_p4, %p2762_p7  ;;  %p2123_p0 = por %p2122_p1, %p2121_p13 }
 0x64c   : > { %p2117_p11 = pneg %p2116_p8 }
 0x64e   : > { %p2124_p6 = pnand %p2123_p0, %p2117_p11 }
 0x668   : > { %v1043_v57 = vpop.f32.mrb[12].mxu0 }
 0x669   : > { %1164 = vrot.lane.b32.xlu1 %v1043_v57, %s2214_s16  ;;  %v1752_v58 = vpop.f32.mrb[13].mxu0  ;;  %s2661_s16 = scalar_lea.hbm %s2761_s30, %s1677_s20 }
 0x66a   : > { %v1046_v59 = vpop.f32.mrb[14].mxu0 }
 0x66b   : > { %v1753_v60 = vpop.f32.mrb[15].mxu0 }
 0x670   : > { %v1153_v61 = vpop.f32.mrb[16].mxu0 }
 0x671   : > { %1168 = vrot.lane.b32.xlu0 %v1153_v61, %s2215_s24  ;;  %v1764_v62 = vpop.f32.mrb[17].mxu0  ;;  %s1484_s24 = scalar_lea.sflag [#allocation4], %s597_s17 }
 0x672   : > { %v1156_v63 = vpop.f32.mrb[18].mxu0 }
 0x673   : > { %v1765_v0 = vpop.f32.mrb[19].mxu0 }
 0x6b7   : > { %v1161_v1 = vpop.permute.xlu0 %1160 }
 0x6b8   : > { %v1171_v3 = vsel %vm720_vm2, %v822_v47, %v1161_v1 }
 0x6db   : > { %v1165_v2 = vpop.permute.xlu1 %1164 }
 0x6dc   : > { %v1173_v4 = vsel %vm1172_vm4, %v1171_v3, %v1165_v2 }
 0x6e3   : > { %v1169_v5 = vpop.permute.xlu0 %1168 }
 0x6e4   : > { %v1175_v6 = vsel %vm1174_vm5, %v1173_v4, %v1169_v5  ;;  %v1668_v5 = vld [vmem:[%s2716_s13] ss:$0 sm:$0xff] }
 0x6e5   : > { %v1176_v7 = vpack.c.bf16 %v1175_v6, %v1175_v6 }
 0x6e7   : > { %1771 = vmatmul.mubr.msk.bf16.vlgmr.msra.gmra.mrb[16].mxu1 %vm611_vm0, %v1176_v7 }
 0x6e8   : > { %1790 = vmatprep.mubr.msk.bf16.mxu1 %vm2201_vm1, %v2200_v8  ;;  %1783 = vmatpush3.bf16.msra.mxu1 %v1916_v34 }
 0x6e9   : > { %1784 = vmatprep.subr.bf16.mxu1 %v2200_v8 }
 0x6ec   : > { %1785 = vmatpush3.bf16.msra.mxu1 %v1917_v35 }
 0x6ed   : > { %1786 = vmatprep.subr.bf16.mxu1 %v2200_v8 }
 0x6f0   : > { %1787 = vmatpush3.bf16.msra.mxu1 %v1918_v36 }
 0x6f1   : > { %1788 = vmatprep.subr.bf16.mxu1 %v2200_v8 }
 0x6f4   : > { %1789 = vmatpush3.bf16.msra.mxu1 %v1919_v37 }
 0x7ba   : > { %v1237_v10 = vpop.f32.mrb[16].mxu1 }
 0x7bb   : > { %v1238_v11 = vadd.f32 %v1658_v9, %v1237_v10  ;;  %v1772_v12 = vpop.f32.mrb[17].mxu1 }
 0x7bc   : > { %v1240_v13 = vpop.f32.mrb[18].mxu1 }
 0x7bd   : > { %v1773_v14 = vpop.f32.mrb[19].mxu1  ;;  %v1243_v15 = vadd.f32 %v1238_v11, %v2535_v18 }
 0x7bf   : > { %v1246_v16 = vsel %vm611_vm0, %v1243_v15, 0.0 }
 0x7c0   : > { %1247 = vadd.xlane.f32.xlu1 %v1246_v16 }
 0x84d   : > { %v1248_v17 = vpop.xlane.xlu1 %1247 }
 0x84e   : > { %v1249_v19 = vmul.f32 0.03125, %v1248_v17 }
 0x850   : > { %v1250_v20 = vsub.f32 %v1243_v15, %v1249_v19 }
 0x852   : > { %v1251_v21 = vmul.f32 %v1250_v20, %v1250_v20 }
 0x854   : > { %v1252_v22 = vsel %vm611_vm0, %v1251_v21, 0.0 }
 0x855   : > { %1253 = vadd.xlane.f32.xlu0 %v1252_v22 }
 0x8e2   : > { %v1254_v18 = vpop.xlane.xlu0 %1253 }
 0x8e3   : > { %v1255_v25 = vmul.f32 0.03125, %v1254_v18 }
 0x8e5   : > { %v1256_v27 = vadd.f32 1e-12, %v1255_v25  ;;  %v1675_v25 = vld [vmem:[%s2760_s21] ss:$0 sm:$0xff] }
 0x8e7   : > { %1938 = vrsqrt.f32 %v1256_v27 }
 0x8f1   : > { %v1939_v28 = vpop.eup %1938 }
 0x8f2   : > { %v1258_v30 = vmul.f32 %v1939_v28, %v1250_v20 }
 0x8f4   : > { %v1265_v31 = vmul.f32 %v1662_v29, %v1258_v30 }
 0x8f6   : > { %v1272_v32 = vadd.f32 %v1663_v26, %v1265_v31 }
 0x8f8   : > { %v1273_v33 = vpack.c.bf16 %v1272_v32, %v1272_v32 }
 0x8fa   : > { %1779 = vmatmul.mubr.msk.bf16.vlgmr.msra.gmra.mrb[20].mxu0 %vm611_vm0, %v1273_v33 }
 0x9cd   : > { %v1334_v39 = vpop.f32.mrb[20].mxu0 }
 0x9ce   : > { %v1335_v40 = vadd.f32 %v1664_v38, %v1334_v39  ;;  %v1780_v41 = vpop.f32.mrb[21].mxu0 }
 0x9cf   : > { %v1337_v42 = vpop.f32.mrb[22].mxu0 }
 0x9d0   : > { %v1341_v43 = vmul.f32 0.70710677, %v1335_v40  ;;  %v1781_v44 = vpop.f32.mrb[23].mxu0  ;;  %v1340_v1 = vmul.f32 0.5, %v1335_v40 }
 0x9d2   : > { %v1342_v45 = vand.u32 2147483647, %v1341_v43  ;;  %vm1361_vm6 = vcmp.ge.f32.partialorder %v1341_v43, 0.0 }
 0x9d4   : > { %v1343_v46 = vmul.f32 0.3275911, %v1342_v45  ;;  %v1355_v8 = vsub.f32 0.0, %v1342_v45 }
 0x9d6   : > { %v1344_v47 = vadd.f32 1.0, %v1343_v46  ;;  %v1356_v49 = vmul.f32 %v1355_v8, %v1342_v45 }
 0x9d8   : > { %1940 = vrcp.f32 %v1344_v47  ;;  %v1357_v52 = vmul.f32 1.442695, %v1356_v49 }
 0x9da   : > { %1942 = vpow2.f32 %v1357_v52 }
 0x9e2   : > { %v1941_v48 = vpop.eup %1940 }
 0x9e3   : > { %v1346_v50 = vmul.f32 1.0614054, %v1941_v48 }
 0x9e4   : > { %v1943_v60 = vpop.eup %1942 }
 0x9e5   : > { %v1347_v51 = vadd.f32 -1.4531521, %v1346_v50 }
 0x9e7   : > { %v1348_v53 = vmul.f32 %v1941_v48, %v1347_v51 }
 0x9e9   : > { %v1349_v54 = vadd.f32 1.4214138, %v1348_v53 }
 0x9eb   : > { %v1350_v55 = vmul.f32 %v1941_v48, %v1349_v54 }
 0x9ed   : > { %v1351_v56 = vadd.f32 -0.28449672, %v1350_v55 }
 0x9ef   : > { %v1352_v57 = vmul.f32 %v1941_v48, %v1351_v56 }
 0x9f1   : > { %v1353_v58 = vadd.f32 0.2548296, %v1352_v57 }
 0x9f3   : > { %v1354_v59 = vmul.f32 %v1941_v48, %v1353_v58 }
 0x9f5   : > { %v1359_v61 = vmul.f32 %v1943_v60, %v1354_v59 }
 0x9f7   : > { %v1360_v62 = vsub.f32 1.0, %v1359_v61 }
 0x9f9   : > { %v1362_v63 = vsub.f32 0.0, %v1360_v62 }
 0x9fb   : > { %v1363_v0 = vsel %vm1361_vm6, %v1360_v62, %v1362_v63 }
 0x9fc   : > { %v1364_v2 = vadd.f32 1.0, %v1363_v0 }
 0x9fe   : > { %v1365_v3 = vmul.f32 %v1364_v2, %v1340_v1 }
 0xa00   : > { %v1366_v4 = vpack.c.bf16 %v1365_v3, %v1365_v3 }
 0xa02   : > { %1791 = vmatmul.mubr.msk.bf16.vlgmr.msra.gmra.mrb[20].mxu1 %vm1406_vm7, %v1366_v4 }
 0xad5   : > { %v1444_v6 = vpop.f32.mrb[20].mxu1 }
 0xad6   : > { %v1445_v7 = vadd.f32 %v1668_v5, %v1444_v6  ;;  %v1792_v9 = vpop.f32.mrb[21].mxu1 }
 0xad7   : > { %v1447_v10 = vpop.f32.mrb[22].mxu1 }
 0xad8   : > { %v1793_v11 = vpop.f32.mrb[23].mxu1  ;;  %v1450_v12 = vadd.f32 %v1445_v7, %v1272_v32 }
 0xada   : > { %v1453_v13 = vsel %vm611_vm0, %v1450_v12, 0.0 }
 0xadb   : > { %1454 = vadd.xlane.f32.xlu0 %v1453_v13 }
 0xb68   : > { %v1455_v14 = vpop.xlane.xlu0 %1454 }
 0xb69   : > { %v1456_v15 = vmul.f32 0.03125, %v1455_v14 }
 0xb6b   : > { %v1457_v16 = vsub.f32 %v1450_v12, %v1456_v15 }
 0xb6d   : > { %v1458_v17 = vmul.f32 %v1457_v16, %v1457_v16 }
 0xb6f   : > { %v1459_v19 = vsel %vm611_vm0, %v1458_v17, 0.0 }
 0xb70   : > { %1460 = vadd.xlane.f32.xlu1 %v1459_v19 }
 0xbfd   : > { %v1461_v20 = vpop.xlane.xlu1 %1460 }
 0xbfe   : > { %v1462_v21 = vmul.f32 0.03125, %v1461_v20 }
 0xc00   : > { %v1463_v22 = vadd.f32 1e-12, %v1462_v21 }
 0xc02   : > { %1944 = vrsqrt.f32 %v1463_v22 }
 0xc0c   : > { %v1945_v23 = vpop.eup %1944 }
 0xc0d   : > { %v1465_v18 = vmul.f32 %v1945_v23, %v1457_v16 }
 0xc0f   : > { %v1472_v27 = vmul.f32 %v1674_v24, %v1465_v18 }
 0xc11   : > { %v1479_v28 = vadd.f32 %v1675_v25, %v1472_v27 }
 0xc13   : > { %v1480_v29 = vpack.c.bf16 %v1479_v28, %v1479_v28 }
 0xc15   : > { %1482 = vst.msk [vmem:[%s599_s28] sm:$0xf] %vm1481_vm8, %v1480_v29 }
 0xc16   : > { %2127 = shalt.err (!%p2124_p6)
}
 0xc17   : > { %s2128_s17 = scalar_lea.hbm %s2661_s16, 64  ;;  %s2132_s21 = scalar_lea.hbm %s2761_s30, 128 }
 0xc18   : > { %p2129_p5 = scmp.ne.s32.totalorder %s2661_s16, %s2128_s17  ;;  %p2133_p10 = scmp.lt.u32.totalorder %s2661_s16, %s2761_s30 }
 0xc19   : > { %p2134_p2 = scmp.lt.u32.totalorder %s2132_s21, %s2128_s17  ;;  %p2136_p4 = scmp.lt.u32.totalorder %s2128_s17, %s2661_s16 }
 0xc1a   : > { %p2130_p9 = pnand %p2129_p5, %p2762_p7 }
 0xc1b   : > { %p2135_p3 = por %p2134_p2, %p2133_p10 }
 0xc1c   : > { %p2131_p12 = pneg %p2130_p9 }
 0xc1d   : > { %p2137_p8 = por %p2136_p4, %p2135_p3 }
 0xc1f   : > { %p2138_p11 = pnand %p2137_p8, %p2131_p12 }
 0xc21   : > { %2141 = shalt.err (!%p2138_p11)
}
 0xc22   : > { %1818 = dma.vmem_to_hbm [thread:$0]  (%p2762_p7), %s2663_s15, 64, %s2661_s16, %s1484_s24  }
 0xc23 PF: > { %s2763_s0 = sld [smem:[#allocation21_spill]]  ;;  %s2764_s23 = sld [smem:[#allocation19_spill]] }
 0xc24   : > { %s2765_s26 = sld [smem:[#allocation25_spill]] }
 0xc29   : > { %p1855_p13 = scmp.ge.s32.totalorder %s2763_s0, 2  ;;  %s1509_s25 = sand.u32 1, %s2764_s23  }
 0xc2a   : > { %p2766_p1 = scmp.ne.s32.totalorder %s2765_s26, 0  ;;  %s1510_s29 = scalar_lea.sflag [#allocation4], %s1509_s25 }
 0xc2c   : > { %p1840_p0 = pnand %p1855_p13, %p2766_p1 }
 0xc2e   : > { %2175 = dma.done.wait (!%p1840_p0), %s1510_s29, 64  }
 0xc2f   : > { %2177 = vsyncadd (!%p1840_p0), %s1510_s29, 4294967232  ;;  %s2767_s24 = sld [smem:[#allocation22_spill]]  ;;  %s2768_s19 = sld [smem:[#allocation20_spill]] }
 0xc30   : > { %s2769_s23 = sld [smem:[#allocation23_spill]]  ;;  %s2770_s21 = smov %s2184_s22 }
 0xc35   : > { %p30_p6 = scmp.ge.s32.totalorder %s2767_s24, 4   ;;  %s2771_s22 = smov %s2768_s19 }
 0xc37   :  { %32 = sbr.rel (!%p30_p6) target bundleno = 12 (0xc), region = 147 }
 0xc3e   :  { %1515 = vsyncpa [#allocation3], 1 }
 0xc3f   :  { %1517 = vsyncpa [#allocation3 + $0x1], 1 }
 0xc40   :  { %1518 = vsyncpa [#allocation6], 1 }
 0xc41   :  { %1519 = vsyncpa [#allocation9], 1 }
 0xc42   :  { %1520 = vsyncpa [#allocation12], 1 }
 0xc43   :  { %1521 = vsyncpa [#allocation4], 1 }
 0xc44   :  { %1523 = vsyncpa [#allocation4 + $0x1], 1 }

</bundles_post_ra>
